<compile_context>
chip_gen: v7x
topology: tpu7x:2x2x1
jax: 0.10.0
libtpu: 0.0.40
codegen_flags: <defaults>
</compile_context>

<pallas_src>
import functools
import math

import jax
import jax.numpy as jnp
from jax.experimental import pallas as pl
from jax.experimental.pallas import tpu as pltpu


def polyattn_kernel(x_ref, mavg_ref, vecs_ref,
                    w1_ref, w2_ref, wqk_ref, rseg_ref,
                    o_ref, *, K, D, eps):
    """Processes a (Bt, K*D) lane-dense tile of the batch per grid step."""
    f32 = jnp.float32
    bf16 = jnp.bfloat16
    KD = K * D

    x = x_ref[...].astype(f32)                         # (Bt, K*D) original input
    mavg = mavg_ref[...]                               # (K*D, K*D) block-average, f32

    vecs = vecs_ref[...]                               # (8, K*D) packed row vectors
    gamma = vecs[0:1]
    beta = vecs[1:2]
    b1 = vecs[2:3]
    b2 = vecs[3:4]
    maskf = vecs[4:5]                                  # mask[h, key_token] per lane

    # ---- LayerNorm over each 32-lane token group (MXU block-average trick) --
    # mean and E[x^2] matmuls are independent -> they pipeline back-to-back.
    mean = jnp.dot(x, mavg, preferred_element_type=f32)
    ex2 = jnp.dot(x * x, mavg, preferred_element_type=f32)
    var = ex2 - mean * mean
    normed = (x - mean) * jax.lax.rsqrt(var + eps) * gamma + beta

    # ---- Per-token MLPs as block-diagonal matmuls (bf16 operands, f32 acc) --
    h1 = jnp.dot(normed.astype(bf16), w1_ref[...], preferred_element_type=f32) + b1
    h1 = jnp.maximum(h1, 0.0)
    token = jnp.dot(h1.astype(bf16), w2_ref[...], preferred_element_type=f32) + b2

    # ---- Fused Q|K projection: kron(I_K, [Wq | Wk]) -> one N=2*KD matmul ----
    qk = jnp.dot(token.astype(bf16), wqk_ref[...], preferred_element_type=f32)
    q = qk[:, :KD]                                     # (Bt, K*D)
    kp = qk[:, KD:]                                    # (Bt, K*D)

    rseg = rseg_ref[...]      # kron(I_{K*H}, ones(dh,dh))/sqrt(dh), bf16
    masked_v = maskf * normed  # hoisted loop-invariant: value * key-token mask

    # ---- Attention via K relative token shifts ------------------------------
    # For each shift r, rotate Q by r*D lanes so Q[token i] lines up with
    # K/V/mask of token j (every (i, j) pair covered exactly once across r);
    # the inverse rotation (KD - s) places the contribution back at token i.
    ctx = x                                            # residual folded in
    for r in range(K):                                 # K is tiny & static
        s = r * D
        q_r = q if s == 0 else pltpu.roll(q, s, axis=1)
        # Head-wise dot product = elementwise product + block-diagonal
        # segment-sum matmul (scale 1/sqrt(d_head) folded into rseg).
        scores = jnp.dot((q_r * kp).astype(bf16), rseg,
                         preferred_element_type=f32)
        contrib = jnp.tanh(scores) * masked_v
        s_inv = (KD - s) % KD
        ctx = ctx + (contrib if s_inv == 0
                     else pltpu.roll(contrib, s_inv, axis=1))

    # ---- Output (residual already included; dropout omitted) ----------------
    o_ref[...] = ctx.astype(o_ref.dtype)


def _pick_block(B, requested):
    if requested is not None:
        return max(8, min(requested, B))
    # Aim for a grid of ~4 balanced steps (2 per TensorCore on v7x) while
    # keeping tiles >= 128 rows; single-TC chips see a short serial loop.
    bt = max(128, -(-B // 4))
    bt = min(bt, 1024, B)
    return -(-bt // 8) * 8          # multiple of 8 sublanes


def polyattn_forward(x, params, *, n_head, d_head, eps=1e-5, block_b=None):
    B, K, D = x.shape
    KD = K * D
    assert n_head * d_head == D, "d_head * n_head must equal dim_h"
    assert D % d_head == 0
    gamma, beta, w1, b1, w2, b2, wq, wk, mask = params
    f32 = jnp.float32
    bf16 = jnp.bfloat16

    # ---- Wrapper-side weight preprocessing (layout plumbing, traced by XLA) -
    eye_k = jnp.eye(K, dtype=f32)
    w1_bd = jnp.einsum('kab,kl->kalb', w1, eye_k).reshape(KD, KD).astype(bf16)
    w2_bd = jnp.einsum('kab,kl->kalb', w2, eye_k).reshape(KD, KD).astype(bf16)
    wq_bd = jnp.kron(eye_k, wq)                                   # per-token Q
    wk_bd = jnp.kron(eye_k, wk)                                   # per-token K
    wqk_bd = jnp.concatenate([wq_bd, wk_bd], axis=1).astype(bf16)  # (KD, 2*KD)
    mavg = jnp.kron(eye_k, jnp.full((D, D), 1.0 / D, f32))        # group mean (f32)
    rseg = (jnp.kron(jnp.eye(K * n_head, dtype=f32),
                     jnp.ones((d_head, d_head), f32))
            * (1.0 / math.sqrt(d_head))).astype(bf16)

    # Pack the five (1, KD) row vectors into one (8, KD) operand.
    # mask_f[i*D + h*d_head + d] = mask[h, i]  (i = key token)
    mask_f = jnp.repeat(mask.T, d_head, axis=1).reshape(KD)
    vecs = jnp.zeros((8, KD), f32)
    vecs = vecs.at[0].set(jnp.tile(gamma.reshape(D), (K,)))
    vecs = vecs.at[1].set(jnp.tile(beta.reshape(D), (K,)))
    vecs = vecs.at[2].set(b1.reshape(KD))
    vecs = vecs.at[3].set(b2.reshape(KD))
    vecs = vecs.at[4].set(mask_f)

    # ---- Lane-dense flattening + batch blocking ------------------------------
    x_flat = x.reshape(B, KD)
    bt = _pick_block(B, block_b)
    pad = (-B) % bt
    if pad:
        x_flat = jnp.pad(x_flat, ((0, pad), (0, 0)))
    Bp = B + pad

    kernel = functools.partial(polyattn_kernel, K=K, D=D, eps=eps)
    full = lambda shape: pl.BlockSpec(shape, lambda b: (0,) * len(shape))

    out = pl.pallas_call(
        kernel,
        out_shape=jax.ShapeDtypeStruct((Bp, KD), x.dtype),
        grid_spec=pltpu.PrefetchScalarGridSpec(
            num_scalar_prefetch=0,
            grid=(Bp // bt,),
            in_specs=[
                pl.BlockSpec((bt, KD), lambda b: (b, 0)),   # x (lane-dense)
                full((KD, KD)),                             # block-average mat (f32)
                full((8, KD)),                              # packed vectors (f32)
                full((KD, KD)),                             # W1 block-diag (bf16)
                full((KD, KD)),                             # W2 block-diag (bf16)
                full((KD, 2 * KD)),                         # kron(I, [Wq|Wk]) (bf16)
                full((KD, KD)),                             # segment-sum mat (bf16)
            ],
            out_specs=pl.BlockSpec((bt, KD), lambda b: (b, 0)),
        ),
        compiler_params=pltpu.CompilerParams(
            dimension_semantics=("parallel",)),
    )(x_flat, mavg, vecs, w1_bd, w2_bd, wqk_bd, rseg)

    return out[:B].reshape(B, K, D)


def polyattn_reference(x, params, *, n_head, d_head, eps=1e-5):
    """Pure-JAX f32 reference (mirrors the PyTorch forward, dropout disabled)."""
    gamma, beta, w1, b1, w2, b2, wq, wk, mask = params
    B, K, D = x.shape
    mu = jnp.mean(x, axis=-1, keepdims=True)
    var = jnp.mean((x - mu) ** 2, axis=-1, keepdims=True)
    normed = (x - mu) / jnp.sqrt(var + eps) * gamma[0] + beta[0]
    h1 = jnp.maximum(jnp.einsum('bkd,kde->bke', normed, w1) + b1[None], 0.0)
    token = jnp.einsum('bkd,kde->bke', h1, w2) + b2[None]
    q = token @ wq
    k = token @ wk
    qh = q.reshape(B, K, n_head, d_head).transpose(0, 2, 1, 3)
    kh = k.reshape(B, K, n_head, d_head).transpose(0, 2, 1, 3)
    vh = normed.reshape(B, K, n_head, d_head).transpose(0, 2, 1, 3)
    s = jnp.tanh(qh @ kh.transpose(0, 1, 3, 2) / math.sqrt(d_head))
    s = s * mask[None, :, None, :]
    ctx = s @ vh                                      # (B, H, K, dh)
    ctx = ctx.transpose(0, 2, 1, 3).reshape(B, K, D)
    return ctx + x


def make_params(key, K, D, n_head, q_exp=1.0):
    ks = jax.random.split(key, 8)
    scale = 1.0 / math.sqrt(D)
    gamma = jnp.ones((1, D), jnp.float32)
    beta = jnp.zeros((1, D), jnp.float32)
    w1 = jax.random.uniform(ks[0], (K, D, D), jnp.float32, -scale, scale)
    b1 = jax.random.uniform(ks[1], (K, D), jnp.float32, -scale, scale)
    w2 = jax.random.uniform(ks[2], (K, D, D), jnp.float32, -scale, scale)
    b2 = jax.random.uniform(ks[3], (K, D), jnp.float32, -scale, scale)
    wq = jax.random.uniform(ks[4], (D, D), jnp.float32, -scale, scale)
    wk = jax.random.uniform(ks[5], (D, D), jnp.float32, -scale, scale)
    bias_scale = jnp.ones((n_head, K), jnp.float32)          # nn.Parameter ones
    bias = jnp.array([1.0 / ((j + 1) ** q_exp) for j in range(K)], jnp.float32)
    mask = bias_scale * bias[None, :]                         # einsum hk,k->hk
    return (gamma, beta, w1, b1, w2, b2, wq, wk, mask)


if __name__ == "__main__":
    # hops=3 -> K=4 tokens, dim_h=32, 4 heads (d_head=8).  Batch 512 ->
    # default block picker gives bt=128, grid=4 (2 steps per core on v7x,
    # short serial loop on v5e/v6e), no padding copy.
    B, K, D, n_head = 512, 4, 32, 4
    d_head = D // n_head

    key = jax.random.PRNGKey(0)
    kx, kp = jax.random.split(key)
    x = jax.random.normal(kx, (B, K, D), jnp.float32)
    params = make_params(kp, K, D, n_head)

    out = polyattn_forward(x, params, n_head=n_head, d_head=d_head)
    out = jax.block_until_ready(out)

    ref = polyattn_reference(x, params, n_head=n_head, d_head=d_head)
    assert out.shape == (B, K, D)
    # bf16 MXU operands (f32 accumulation) -> relaxed tolerance vs f32 reference.
    assert jnp.allclose(out, ref, atol=2e-2, rtol=2e-2), "mismatch vs reference"

    print("KERNEL_OK")
</pallas_src>

<mosaic_0001>
module attributes {stable_mosaic.version = 11 : i64} {
  func.func @polyattn_kernel(%arg0: i32, %arg1: memref<128x128xf32, #tpu.memory_space<vmem>>, %arg2: memref<128x128xf32, #tpu.memory_space<vmem>>, %arg3: memref<8x128xf32, #tpu.memory_space<vmem>>, %arg4: memref<128x128xbf16, #tpu.memory_space<vmem>>, %arg5: memref<128x128xbf16, #tpu.memory_space<vmem>>, %arg6: memref<128x256xbf16, #tpu.memory_space<vmem>>, %arg7: memref<128x128xbf16, #tpu.memory_space<vmem>>, %arg8: memref<128x128xf32, #tpu.memory_space<vmem>>) attributes {dimension_semantics = [#tpu.dimension_semantics<parallel>], iteration_bounds = array<i64: 4>, scalar_prefetch = 0 : i64, scratch_operands = 0 : i64, tpu.core_type = #tpu.core_type<tc>, window_params = [{transform_indices = @transform_0, window_bounds = array<i64: 128, 128>}, {pipeline_mode = #tpu.pipeline_mode<synchronous>, transform_indices = @transform_1, window_bounds = array<i64: 128, 128>}, {pipeline_mode = #tpu.pipeline_mode<synchronous>, transform_indices = @transform_2, window_bounds = array<i64: 8, 128>}, {pipeline_mode = #tpu.pipeline_mode<synchronous>, transform_indices = @transform_3, window_bounds = array<i64: 128, 128>}, {pipeline_mode = #tpu.pipeline_mode<synchronous>, transform_indices = @transform_4, window_bounds = array<i64: 128, 128>}, {pipeline_mode = #tpu.pipeline_mode<synchronous>, transform_indices = @transform_5, window_bounds = array<i64: 128, 256>}, {pipeline_mode = #tpu.pipeline_mode<synchronous>, transform_indices = @transform_6, window_bounds = array<i64: 128, 128>}, {transform_indices = @transform_7, window_bounds = array<i64: 128, 128>}]} {
    %c0 = arith.constant 0 : index
    %c0_0 = arith.constant 0 : index
    %0 = vector.load %arg1[%c0, %c0_0] : memref<128x128xf32, #tpu.memory_space<vmem>>, vector<128x128xf32>
    %c0_1 = arith.constant 0 : index
    %c0_2 = arith.constant 0 : index
    %1 = vector.load %arg2[%c0_1, %c0_2] : memref<128x128xf32, #tpu.memory_space<vmem>>, vector<128x128xf32>
    %c0_3 = arith.constant 0 : index
    %c0_4 = arith.constant 0 : index
    %2 = vector.load %arg3[%c0_3, %c0_4] : memref<8x128xf32, #tpu.memory_space<vmem>>, vector<8x128xf32>
    %3 = vector.extract_strided_slice %2 {offsets = [0, 0], sizes = [1, 128], strides = [1, 1]} : vector<8x128xf32> to vector<1x128xf32>
    %4 = vector.extract_strided_slice %2 {offsets = [1, 0], sizes = [1, 128], strides = [1, 1]} : vector<8x128xf32> to vector<1x128xf32>
    %5 = vector.extract_strided_slice %2 {offsets = [2, 0], sizes = [1, 128], strides = [1, 1]} : vector<8x128xf32> to vector<1x128xf32>
    %6 = vector.extract_strided_slice %2 {offsets = [3, 0], sizes = [1, 128], strides = [1, 1]} : vector<8x128xf32> to vector<1x128xf32>
    %7 = vector.extract_strided_slice %2 {offsets = [4, 0], sizes = [1, 128], strides = [1, 1]} : vector<8x128xf32> to vector<1x128xf32>
    %cst = arith.constant dense<0.000000e+00> : vector<128x128xf32>
    %8 = tpu.matmul %0, %1, %cst {dimension_numbers = #tpu.dot_dimension_numbers<[1], [0], [0], [1], [0, 0, 1, 1], [], []>} : vector<128x128xf32>, vector<128x128xf32>, vector<128x128xf32> -> vector<128x128xf32>
    %9 = arith.mulf %0, %0 : vector<128x128xf32>
    %cst_5 = arith.constant dense<0.000000e+00> : vector<128x128xf32>
    %10 = tpu.matmul %9, %1, %cst_5 {dimension_numbers = #tpu.dot_dimension_numbers<[1], [0], [0], [1], [0, 0, 1, 1], [], []>} : vector<128x128xf32>, vector<128x128xf32>, vector<128x128xf32> -> vector<128x128xf32>
    %11 = arith.mulf %8, %8 : vector<128x128xf32>
    %12 = arith.subf %10, %11 : vector<128x128xf32>
    %13 = arith.subf %0, %8 : vector<128x128xf32>
    %cst_6 = arith.constant 9.99999974E-6 : f32
    %14 = vector.broadcast %cst_6 : f32 to vector<128x128xf32>
    %15 = arith.addf %12, %14 : vector<128x128xf32>
    %16 = math.rsqrt %15 : vector<128x128xf32>
    %17 = arith.mulf %13, %16 : vector<128x128xf32>
    %18 = vector.broadcast %3 : vector<1x128xf32> to vector<128x128xf32>
    %19 = arith.mulf %17, %18 : vector<128x128xf32>
    %20 = vector.broadcast %4 : vector<1x128xf32> to vector<128x128xf32>
    %21 = arith.addf %19, %20 : vector<128x128xf32>
    %22 = arith.truncf %21 : vector<128x128xf32> to vector<128x128xbf16>
    %c0_7 = arith.constant 0 : index
    %c0_8 = arith.constant 0 : index
    %23 = vector.load %arg4[%c0_7, %c0_8] : memref<128x128xbf16, #tpu.memory_space<vmem>>, vector<128x128xbf16>
    %cst_9 = arith.constant dense<0.000000e+00> : vector<128x128xf32>
    %24 = tpu.matmul %22, %23, %cst_9 {dimension_numbers = #tpu.dot_dimension_numbers<[1], [0], [0], [1], [0, 0, 1, 1], [], []>} : vector<128x128xbf16>, vector<128x128xbf16>, vector<128x128xf32> -> vector<128x128xf32>
    %25 = vector.broadcast %5 : vector<1x128xf32> to vector<128x128xf32>
    %26 = arith.addf %24, %25 : vector<128x128xf32>
    %cst_10 = arith.constant 0.000000e+00 : f32
    %27 = vector.broadcast %cst_10 : f32 to vector<128x128xf32>
    %28 = arith.maximumf %26, %27 : vector<128x128xf32>
    %29 = arith.truncf %28 : vector<128x128xf32> to vector<128x128xbf16>
    %c0_11 = arith.constant 0 : index
    %c0_12 = arith.constant 0 : index
    %30 = vector.load %arg5[%c0_11, %c0_12] : memref<128x128xbf16, #tpu.memory_space<vmem>>, vector<128x128xbf16>
    %cst_13 = arith.constant dense<0.000000e+00> : vector<128x128xf32>
    %31 = tpu.matmul %29, %30, %cst_13 {dimension_numbers = #tpu.dot_dimension_numbers<[1], [0], [0], [1], [0, 0, 1, 1], [], []>} : vector<128x128xbf16>, vector<128x128xbf16>, vector<128x128xf32> -> vector<128x128xf32>
    %32 = vector.broadcast %6 : vector<1x128xf32> to vector<128x128xf32>
    %33 = arith.addf %31, %32 : vector<128x128xf32>
    %34 = arith.truncf %33 : vector<128x128xf32> to vector<128x128xbf16>
    %c0_14 = arith.constant 0 : index
    %c0_15 = arith.constant 0 : index
    %35 = vector.load %arg6[%c0_14, %c0_15] : memref<128x256xbf16, #tpu.memory_space<vmem>>, vector<128x256xbf16>
    %cst_16 = arith.constant dense<0.000000e+00> : vector<128x256xf32>
    %36 = tpu.matmul %34, %35, %cst_16 {dimension_numbers = #tpu.dot_dimension_numbers<[1], [0], [0], [1], [0, 0, 1, 1], [], []>} : vector<128x128xbf16>, vector<128x256xbf16>, vector<128x256xf32> -> vector<128x256xf32>
    %37 = vector.extract_strided_slice %36 {offsets = [0, 0], sizes = [128, 128], strides = [1, 1]} : vector<128x256xf32> to vector<128x128xf32>
    %38 = vector.extract_strided_slice %36 {offsets = [0, 128], sizes = [128, 128], strides = [1, 1]} : vector<128x256xf32> to vector<128x128xf32>
    %c0_17 = arith.constant 0 : index
    %c0_18 = arith.constant 0 : index
    %39 = vector.load %arg7[%c0_17, %c0_18] : memref<128x128xbf16, #tpu.memory_space<vmem>>, vector<128x128xbf16>
    %40 = vector.broadcast %7 : vector<1x128xf32> to vector<128x128xf32>
    %41 = arith.mulf %40, %21 : vector<128x128xf32>
    %42 = arith.mulf %37, %38 : vector<128x128xf32>
    %43 = arith.truncf %42 : vector<128x128xf32> to vector<128x128xbf16>
    %cst_19 = arith.constant dense<0.000000e+00> : vector<128x128xf32>
    %44 = tpu.matmul %43, %39, %cst_19 {dimension_numbers = #tpu.dot_dimension_numbers<[1], [0], [0], [1], [0, 0, 1, 1], [], []>} : vector<128x128xbf16>, vector<128x128xbf16>, vector<128x128xf32> -> vector<128x128xf32>
    %45 = math.tanh %44 : vector<128x128xf32>
    %46 = arith.mulf %45, %41 : vector<128x128xf32>
    %47 = arith.addf %0, %46 : vector<128x128xf32>
    %c32_i32 = arith.constant 32 : i32
    %48 = tpu.dynamic_rotate %37 by %c32_i32 dim 1 : vector<128x128xf32>, i32 -> vector<128x128xf32>
    %49 = arith.mulf %48, %38 : vector<128x128xf32>
    %50 = arith.truncf %49 : vector<128x128xf32> to vector<128x128xbf16>
    %cst_20 = arith.constant dense<0.000000e+00> : vector<128x128xf32>
    %51 = tpu.matmul %50, %39, %cst_20 {dimension_numbers = #tpu.dot_dimension_numbers<[1], [0], [0], [1], [0, 0, 1, 1], [], []>} : vector<128x128xbf16>, vector<128x128xbf16>, vector<128x128xf32> -> vector<128x128xf32>
    %52 = math.tanh %51 : vector<128x128xf32>
    %53 = arith.mulf %52, %41 : vector<128x128xf32>
    %c96_i32 = arith.constant 96 : i32
    %54 = tpu.dynamic_rotate %53 by %c96_i32 dim 1 : vector<128x128xf32>, i32 -> vector<128x128xf32>
    %55 = arith.addf %47, %54 : vector<128x128xf32>
    %c64_i32 = arith.constant 64 : i32
    %56 = tpu.dynamic_rotate %37 by %c64_i32 dim 1 : vector<128x128xf32>, i32 -> vector<128x128xf32>
    %57 = arith.mulf %56, %38 : vector<128x128xf32>
    %58 = arith.truncf %57 : vector<128x128xf32> to vector<128x128xbf16>
    %cst_21 = arith.constant dense<0.000000e+00> : vector<128x128xf32>
    %59 = tpu.matmul %58, %39, %cst_21 {dimension_numbers = #tpu.dot_dimension_numbers<[1], [0], [0], [1], [0, 0, 1, 1], [], []>} : vector<128x128xbf16>, vector<128x128xbf16>, vector<128x128xf32> -> vector<128x128xf32>
    %60 = math.tanh %59 : vector<128x128xf32>
    %61 = arith.mulf %60, %41 : vector<128x128xf32>
    %c64_i32_22 = arith.constant 64 : i32
    %62 = tpu.dynamic_rotate %61 by %c64_i32_22 dim 1 : vector<128x128xf32>, i32 -> vector<128x128xf32>
    %63 = arith.addf %55, %62 : vector<128x128xf32>
    %c96_i32_23 = arith.constant 96 : i32
    %64 = tpu.dynamic_rotate %37 by %c96_i32_23 dim 1 : vector<128x128xf32>, i32 -> vector<128x128xf32>
    %65 = arith.mulf %64, %38 : vector<128x128xf32>
    %66 = arith.truncf %65 : vector<128x128xf32> to vector<128x128xbf16>
    %cst_24 = arith.constant dense<0.000000e+00> : vector<128x128xf32>
    %67 = tpu.matmul %66, %39, %cst_24 {dimension_numbers = #tpu.dot_dimension_numbers<[1], [0], [0], [1], [0, 0, 1, 1], [], []>} : vector<128x128xbf16>, vector<128x128xbf16>, vector<128x128xf32> -> vector<128x128xf32>
    %68 = math.tanh %67 : vector<128x128xf32>
    %69 = arith.mulf %68, %41 : vector<128x128xf32>
    %c32_i32_25 = arith.constant 32 : i32
    %70 = tpu.dynamic_rotate %69 by %c32_i32_25 dim 1 : vector<128x128xf32>, i32 -> vector<128x128xf32>
    %71 = arith.addf %63, %70 : vector<128x128xf32>
    %c0_26 = arith.constant 0 : index
    %c0_27 = arith.constant 0 : index
    %72 = vector.load %arg8[%c0_26, %c0_27] : memref<128x128xf32, #tpu.memory_space<vmem>>, vector<128x128xf32>
    tpu.vector_store %arg8[%c0_26, %c0_27], %71 {strides = array<i32>} : memref<128x128xf32, #tpu.memory_space<vmem>>, vector<128x128xf32>,
    return
  }
  func.func @transform_0(%arg0: i32) -> (i32, i32) {
    %c0_i32 = arith.constant 0 : i32
    %c0_i32_0 = arith.constant 0 : i32
    return %arg0, %c0_i32 : i32, i32
  }
  func.func @transform_1(%arg0: i32) -> (i32, i32) {
    %c0_i32 = arith.constant 0 : i32
    %c0_i32_0 = arith.constant 0 : i32
    %c0_i32_1 = arith.constant 0 : i32
    return %c0_i32, %c0_i32_0 : i32, i32
  }
  func.func @transform_2(%arg0: i32) -> (i32, i32) {
    %c0_i32 = arith.constant 0 : i32
    %c0_i32_0 = arith.constant 0 : i32
    %c0_i32_1 = arith.constant 0 : i32
    return %c0_i32, %c0_i32_0 : i32, i32
  }
  func.func @transform_3(%arg0: i32) -> (i32, i32) {
    %c0_i32 = arith.constant 0 : i32
    %c0_i32_0 = arith.constant 0 : i32
    %c0_i32_1 = arith.constant 0 : i32
    return %c0_i32, %c0_i32_0 : i32, i32
  }
  func.func @transform_4(%arg0: i32) -> (i32, i32) {
    %c0_i32 = arith.constant 0 : i32
    %c0_i32_0 = arith.constant 0 : i32
    %c0_i32_1 = arith.constant 0 : i32
    return %c0_i32, %c0_i32_0 : i32, i32
  }
  func.func @transform_5(%arg0: i32) -> (i32, i32) {
    %c0_i32 = arith.constant 0 : i32
    %c0_i32_0 = arith.constant 0 : i32
    %c0_i32_1 = arith.constant 0 : i32
    return %c0_i32, %c0_i32_0 : i32, i32
  }
  func.func @transform_6(%arg0: i32) -> (i32, i32) {
    %c0_i32 = arith.constant 0 : i32
    %c0_i32_0 = arith.constant 0 : i32
    %c0_i32_1 = arith.constant 0 : i32
    return %c0_i32, %c0_i32_0 : i32, i32
  }
  func.func @transform_7(%arg0: i32) -> (i32, i32) {
    %c0_i32 = arith.constant 0 : i32
    %c0_i32_0 = arith.constant 0 : i32
    return %arg0, %c0_i32 : i32, i32
  }
}

</mosaic_0001>

<bundles_post_ra>
// kernel: tpu_custom_call.1
= control target key start
LH: loop header
LB: loop body
LE: loop exit
PB: predicated region body
PF: predicated region fallthrough
CT: control target
= control target key end

     0   :  { %12 = vsyncpa [#allocation3], 0  ;;  %s5082_s0 = inlined_call_operand.hbm [shape: f32[512,128], index: 0, kind: input, shape index: {}]   ;;  %s5083_s1 = inlined_call_operand.hbm [shape: f32[128,128], index: 1, kind: input, shape index: {}]   ;;  %s5084_s2 = inlined_call_operand.hbm [shape: f32[8,128], index: 2, kind: input, shape index: {}]   ;;  %s5085_s3 = inlined_call_operand.hbm [shape: bf16[128,128], index: 3, kind: input, shape index: {}]   ;;  %s5086_s4 = inlined_call_operand.hbm [shape: bf16[128,128], index: 4, kind: input, shape index: {}]   ;;  %s5087_s5 = inlined_call_operand.hbm [shape: bf16[128,256], index: 5, kind: input, shape index: {}]   ;;  %s5088_s6 = inlined_call_operand.hbm [shape: bf16[128,128], index: 6, kind: input, shape index: {}]   ;;  %s5089_s7 = inlined_call_operand.hbm [shape: f32[512,128], index: 7, kind: output, shape index: {}]  }
   0x1   :  { %14 = vsyncpa [#allocation3 + $0x1], 0 }
   0x2   :  { %15 = vsyncpa [#allocation6], 0 }
   0x3   :  { %16 = vsyncpa [#allocation9], 0 }
   0x4   :  { %17 = vsyncpa [#allocation12], 0 }
   0x5   :  { %18 = vsyncpa [#allocation4], 0 }
   0x6   :  { %20 = vsyncpa [#allocation4 + $0x1], 0  ;;  %s3824_s24 = smov 0   ;;  %s3826_s25 = smov 0  }
   0x7   :  { %s3828_s26 = smov 0   ;;  %s3830_s27 = smov 0  }
   0x8 LB: > { %s3766_s28 = smov [#allocation5]   ;;  %s3845_s30 = sadd.s32 4294967295, %s3764_s27   ;;  %s3764_s27 = sphi %s3830_s27, %s5128_s27   ;;  %s3760_s26 = sphi %s3828_s26, %s5127_s26   ;;  %s3756_s25 = sphi %s3826_s25, %s5126_s25   ;;  %s3752_s24 = sphi %s3824_s24, %s5125_s24  }
   0x9   : > { %s221_s29 = sshll.u32 %s3766_s28, 4  ;;  %p2552_p0 = scmp.ge.s32.totalorder %s3764_s27, 1  ;;  %s3850_s29 = int_to_ptr.vmem [resolvable:$true] %s221_s29 }
   0xa   : > { %p5090_p1 = scmp.eq.s32.totalorder %s3845_s30, 0  ;;  %p209_p2 = scmp.lt.s32.totalorder %s3764_s27, 5 }
   0xb   : > { %s3767_s9 = smov [#allocation8]   ;;  %s3768_s12 = smov [#allocation11]  }
   0xc   : > { %p3852_p3 = pnand %p2552_p0, %p209_p2  ;;  %s245_s10 = sshll.u32 %s3767_s9, 4  ;;  %s3864_s10 = int_to_ptr.vmem [resolvable:$true] %s245_s10 }
   0xd   : > { %s3866_s13 = sshll.u32 %s3768_s12, 4  ;;  %s3488_s16 = scalar_lea.hbm %s5083_s1, 2048  ;;  %s272_s13 = int_to_ptr.vmem [resolvable:$true] %s3866_s13 }
   0xe   : > { %s5098_s8 = scalar_select %p3852_p3, 1, 0 }
   0xf   : > { %p3175_p4 = pneg %p3852_p3  ;;  %p3489_p6 = scmp.ne.s32.totalorder %s5083_s1, %s3488_s16 }
  0x10   : > { %p3495_p10 = scmp.lt.u32.totalorder %s3488_s16, %s5083_s1 }
  0x11   : > { %p3860_p5 = pnand %p3175_p4, %p5090_p1 }
  0x13   : > { %p3876_p7 = pneg %p3860_p5 }
  0x15   : > { %p3491_p8 = pnand %p3876_p7, %p3489_p6 }
  0x17   : > { %p3492_p9 = pneg %p3491_p8 }
  0x19   : > { %p3497_p11 = pnand %p3495_p10, %p3492_p9 }
  0x1b   : > { %3500 = shalt.err (!%p3497_p11)
}
  0x1c   : > { %s3501_s22 = scalar_lea.vmem %s3850_s29, 2048  ;;  %p3509_p2 = scmp.lt.s32.totalorder %s3850_s29, %s3850_s29 }
  0x1d   : > { %p3502_p12 = scmp.ne.s32.totalorder %s3850_s29, %s3501_s22  ;;  %p3510_p4 = scmp.lt.s32.totalorder %s3501_s22, %s3501_s22 }
  0x1f   : > { %p3504_p13 = pnand %p3502_p12, %p3876_p7  ;;  %p3511_p6 = por %p3510_p4, %p3509_p2 }
  0x21   : > { %p3505_p0 = pneg %p3504_p13 }
  0x23   : > { %p3512_p8 = pnand %p3511_p6, %p3505_p0 }
  0x25   : > { %3515 = shalt.err (!%p3512_p8)
}
  0x26   : > { %s5096_s23 = smov 128   ;;  %s3770_s28 = smov 8  }
  0x27   : > { %3178 = dma.hbm_to_vmem [thread:$0]  (!%p3860_p5), %s5083_s1, 2048, %s3850_s29, [#allocation6], %s5096_s23, %s5096_s23, %s3770_s28  }
  0x28   : > { %s3516_s16 = scalar_lea.hbm %s5085_s3, 1024 }
  0x29   : > { %p3517_p9 = scmp.ne.s32.totalorder %s5085_s3, %s3516_s16  ;;  %p3523_p12 = scmp.lt.u32.totalorder %s3516_s16, %s5085_s3 }
  0x2b   : > { %p3519_p10 = pnand %p3517_p9, %p3876_p7 }
  0x2d   : > { %p3520_p11 = pneg %p3519_p10 }
  0x2f   : > { %p3525_p13 = pnand %p3523_p12, %p3520_p11 }
  0x31   : > { %3528 = shalt.err (!%p3525_p13)
}
  0x32   : > { %s3529_s29 = scalar_lea.vmem %s3864_s10, 1024  ;;  %p3537_p6 = scmp.lt.s32.totalorder %s3864_s10, %s3864_s10 }
  0x33   : > { %p3530_p0 = scmp.ne.s32.totalorder %s3864_s10, %s3529_s29  ;;  %p3538_p8 = scmp.lt.s32.totalorder %s3529_s29, %s3529_s29 }
  0x35   : > { %p3532_p2 = pnand %p3530_p0, %p3876_p7  ;;  %p3539_p9 = por %p3538_p8, %p3537_p6 }
  0x37   : > { %p3533_p4 = pneg %p3532_p2 }
  0x39   : > { %p3540_p10 = pnand %p3539_p9, %p3533_p4 }
  0x3b   : > { %3543 = shalt.err (!%p3540_p10)
}
  0x3c   : > { %s5092_s22 = smov 64   ;;  %s5094_s9 = smov 4  }
  0x3d   : > { %3184 = dma.hbm_to_vmem [thread:$0]  (!%p3860_p5), %s5085_s3, 1024, %s3864_s10, [#allocation9], %s5092_s22, %s5092_s22, %s5094_s9  }
  0x3e   : > { %s3544_s17 = scalar_lea.hbm %s5087_s5, 2048 }
  0x3f   : > { %p3545_p11 = scmp.ne.s32.totalorder %s5087_s5, %s3544_s17  ;;  %p3551_p0 = scmp.lt.u32.totalorder %s3544_s17, %s5087_s5 }
  0x41   : > { %p3547_p12 = pnand %p3545_p11, %p3876_p7 }
  0x43   : > { %p3548_p13 = pneg %p3547_p12 }
  0x45   : > { %p3553_p2 = pnand %p3551_p0, %p3548_p13 }
  0x47   : > { %3556 = shalt.err (!%p3553_p2)
}
  0x48   : > { %s3557_s12 = scalar_lea.vmem %s272_s13, 2048  ;;  %p3565_p9 = scmp.lt.s32.totalorder %s272_s13, %s272_s13 }
  0x49   : > { %p3558_p4 = scmp.ne.s32.totalorder %s272_s13, %s3557_s12  ;;  %p3566_p10 = scmp.lt.s32.totalorder %s3557_s12, %s3557_s12 }
  0x4b   : > { %p3560_p6 = pnand %p3558_p4, %p3876_p7  ;;  %p3567_p1 = por %p3566_p10, %p3565_p9 }
  0x4d   : > { %p3561_p8 = pneg %p3560_p6 }
  0x4f   : > { %p3568_p3 = pnand %p3567_p1, %p3561_p8 }
  0x51   : > { %3571 = shalt.err (!%p3568_p3)
}
  0x52   : > { %3190 = dma.hbm_to_vmem [thread:$0]  (!%p3860_p5), %s5087_s5, 2048, %s272_s13, [#allocation12], %s5096_s23, %s5096_s23, %s3770_s28  }
  0x53   : > { %s3773_s15 = smov [#allocation7]   ;;  %s3774_s17 = smov [#allocation10]  }
  0x54   : > { %s235_s16 = sshll.u32 %s3773_s15, 4  ;;  %s258_s18 = sshll.u32 %s3774_s17, 4  ;;  %s236_s16 = int_to_ptr.vmem [resolvable:$true] %s235_s16  ;;  %s259_s18 = int_to_ptr.vmem [resolvable:$true] %s258_s18 }
  0x55   : > { %s3572_s29 = scalar_lea.hbm %s5084_s2, 128 }
  0x56   : > { %p3573_p1 = scmp.ne.s32.totalorder %s5084_s2, %s3572_s29  ;;  %p3579_p12 = scmp.lt.u32.totalorder %s3572_s29, %s5084_s2 }
  0x58   : > { %p3575_p3 = pnand %p3573_p1, %p3876_p7 }
  0x5a   : > { %p3576_p11 = pneg %p3575_p3 }
  0x5c   : > { %p3581_p13 = pnand %p3579_p12, %p3576_p11 }
  0x5e   : > { %3584 = shalt.err (!%p3581_p13)
}
  0x5f   : > { %s3585_s13 = scalar_lea.vmem %s236_s16, 128  ;;  %p3593_p6 = scmp.lt.s32.totalorder %s236_s16, %s236_s16 }
  0x60   : > { %p3586_p0 = scmp.ne.s32.totalorder %s236_s16, %s3585_s13  ;;  %p3594_p8 = scmp.lt.s32.totalorder %s3585_s13, %s3585_s13 }
  0x62   : > { %p3588_p2 = pnand %p3586_p0, %p3876_p7  ;;  %p3595_p9 = por %p3594_p8, %p3593_p6 }
  0x64   : > { %p3589_p4 = pneg %p3588_p2 }
  0x66   : > { %p3596_p10 = pnand %p3595_p9, %p3589_p4 }
  0x68   : > { %3599 = shalt.err (!%p3596_p10)
}
  0x69   : > { %3181 = dma.hbm_to_vmem [thread:$0]  (!%p3860_p5), %s5084_s2, 128, %s236_s16, [#allocation6]  }
  0x6a   : > { %s3600_s17 = scalar_lea.hbm %s5086_s4, 1024 }
  0x6b   : > { %p3601_p1 = scmp.ne.s32.totalorder %s5086_s4, %s3600_s17  ;;  %p3607_p12 = scmp.lt.u32.totalorder %s3600_s17, %s5086_s4 }
  0x6d   : > { %p3603_p3 = pnand %p3601_p1, %p3876_p7 }
  0x6f   : > { %p3604_p11 = pneg %p3603_p3 }
  0x71   : > { %p3609_p13 = pnand %p3607_p12, %p3604_p11 }
  0x73   : > { %3612 = shalt.err (!%p3609_p13)
}
  0x74   : > { %s3613_s10 = scalar_lea.vmem %s259_s18, 1024  ;;  %p3621_p6 = scmp.lt.s32.totalorder %s259_s18, %s259_s18 }
  0x75   : > { %p3614_p0 = scmp.ne.s32.totalorder %s259_s18, %s3613_s10  ;;  %p3622_p8 = scmp.lt.s32.totalorder %s3613_s10, %s3613_s10 }
  0x77   : > { %p3616_p2 = pnand %p3614_p0, %p3876_p7  ;;  %p3623_p9 = por %p3622_p8, %p3621_p6 }
  0x79   : > { %p3617_p4 = pneg %p3616_p2 }
  0x7b   : > { %p3624_p10 = pnand %p3623_p9, %p3617_p4 }
  0x7d   : > { %3627 = shalt.err (!%p3624_p10)
}
  0x7e   : > { %s5101_s16 = smov 4   ;;  %s5102_s13 = smov 64  }
  0x7f   : > { %3187 = dma.hbm_to_vmem [thread:$0]  (!%p3860_p5), %s5086_s4, 1024, %s259_s18, [#allocation9], %s5102_s13, %s5102_s13, %s5101_s16  }
  0x80   : > { %s3775_s9 = smov [#allocation13]   ;;  %s3628_s21 = scalar_lea.hbm %s5088_s6, 1024 }
  0x81   : > { %s284_s15 = sshll.u32 %s3775_s9, 4  ;;  %p3629_p1 = scmp.ne.s32.totalorder %s5088_s6, %s3628_s21  ;;  %s285_s15 = int_to_ptr.vmem [resolvable:$true] %s284_s15 }
  0x82   : > { %p3635_p12 = scmp.lt.u32.totalorder %s3628_s21, %s5088_s6 }
  0x83   : > { %p3631_p3 = pnand %p3629_p1, %p3876_p7 }
  0x85   : > { %p3632_p11 = pneg %p3631_p3 }
  0x87   : > { %p3637_p13 = pnand %p3635_p12, %p3632_p11 }
  0x89   : > { %3640 = shalt.err (!%p3637_p13)
}
  0x8a   : > { %s3641_s18 = scalar_lea.vmem %s285_s15, 1024  ;;  %p3649_p6 = scmp.lt.s32.totalorder %s285_s15, %s285_s15 }
  0x8b   : > { %p3642_p0 = scmp.ne.s32.totalorder %s285_s15, %s3641_s18  ;;  %p3650_p8 = scmp.lt.s32.totalorder %s3641_s18, %s3641_s18 }
  0x8d   : > { %p3644_p2 = pnand %p3642_p0, %p3876_p7  ;;  %p3651_p9 = por %p3650_p8, %p3649_p6 }
  0x8f   : > { %p3645_p4 = pneg %p3644_p2 }
  0x91   : > { %p3652_p10 = pnand %p3651_p9, %p3645_p4 }
  0x93   : > { %3655 = shalt.err (!%p3652_p10)
}
  0x94   : > { %3193 = dma.hbm_to_vmem [thread:$0]  (!%p3860_p5), %s5088_s6, 1024, %s285_s15, [#allocation12], %s5102_s13, %s5102_s13, %s5101_s16  }
  0x95   : > { %s2551_s11 = sadd.s32 4294967294, %s3764_s27   ;;  %s4010_s19 = sadd.s32 1, %s3764_s27  }
  0x96   : > { %s30_s14 = ssub.s32 %s3764_s27, %s4010_s19  ;;  %s33_s9 = sadd.s32 1, %s3760_s26 }
  0x97   : > { %p31_p7 = scmp.eq.s32.totalorder %s30_s14, 0  ;;  %p40_p1 = scmp.ne.s32.totalorder %s3760_s26, %s3756_s25 }
  0x98   : > { %p41_p3 = scmp.eq.s32.totalorder %s3764_s27, 0  ;;  %p46_p11 = scmp.ne.s32.totalorder %s3756_s25, %s3752_s24 }
  0x99   : > { %s4021_s17 = scalar_select %p31_p7, %s3760_s26, %s33_s9  }
  0x9a   : > { %p4023_p12 = por %p41_p3, %p40_p1  ;;  %p5104_p13 = scmp.eq.s32.totalorder %s3845_s30, 0 }
  0x9b   : > { %p196_p0 = scmp.eq.s32.totalorder %s3845_s30, 3  ;;  %p202_p2 = scmp.eq.s32.totalorder %s2551_s11, 3 }
  0x9c   : > { %p4029_p5 = por %p5104_p13, %p46_p11  ;;  %p3208_p4 = scmp.lt.s32.totalorder %s3764_s27, 4 }
  0x9d   : > { %s298_s13 = sand.u32 1, %s3760_s26   ;;  %p4036_p6 = por %p196_p0, %p40_p1 }
  0x9e   : > { %p4040_p8 = por %p202_p2, %p46_p11  ;;  %s2560_s29 = sshll.u32 %s298_s13, 7 }
  0x9f   : > { %s5106_s15 = scalar_select %p4036_p6, 1, 0 }
  0xa0   : > { %s5107_s21 = scalar_select %p4040_p8, 1, 0 }
  0xa1   : > { %s2617_s12 = sshll.u32 %s3764_s27, 11  ;;  %s302_s22 = scalar_lea.vmem [#allocation2], %s2560_s29 }
  0xa2   : > { %s4048_s23 = scalar_lea.hbm %s5082_s0, %s2617_s12  ;;  %s309_s11 = sshll.u32 %s302_s22, 4  ;;  %s4050_s11 = int_to_ptr.vmem [resolvable:$true] %s309_s11 }
  0xa3   : > { %p4054_p9 = pnand %p3208_p4, %p4023_p12  ;;  %s4058_s9 = scalar_lea.sflag [#allocation3], %s298_s13 }
  0xa4   : > { %s3656_s10 = scalar_lea.hbm %s4048_s23, 2048  ;;  %s3661_s20 = scalar_lea.hbm %s5082_s0, 8192 }
  0xa5   : > { %p3657_p10 = scmp.ne.s32.totalorder %s4048_s23, %s3656_s10  ;;  %p3658_p7 = pneg %p4054_p9 }
  0xa6   : > { %p3662_p11 = scmp.lt.u32.totalorder %s4048_s23, %s5082_s0  ;;  %p3663_p12 = scmp.lt.u32.totalorder %s3661_s20, %s3656_s10 }
  0xa7   : > { %p3659_p1 = pnand %p3658_p7, %p3657_p10  ;;  %p3665_p0 = scmp.lt.u32.totalorder %s3656_s10, %s4048_s23 }
  0xa8   : > { %p3664_p13 = por %p3663_p12, %p3662_p11 }
  0xa9   : > { %p3660_p3 = pneg %p3659_p1 }
  0xaa   : > { %p3666_p2 = por %p3665_p0, %p3664_p13 }
  0xac   : > { %p3667_p4 = pnand %p3666_p2, %p3660_p3 }
  0xae   : > { %3670 = shalt.err (!%p3667_p4)
}
  0xaf   : > { %s3671_s13 = scalar_lea.vmem %s4050_s11, 2048  ;;  %s3776_s29 = smov [#allocation2]  }
  0xb0   : > { %p3672_p10 = scmp.ne.s32.totalorder %s4050_s11, %s3671_s13  ;;  %s3676_s12 = sshll.u32 %s3776_s29, 4  ;;  %s3677_s12 = int_to_ptr.vmem [resolvable:$false] %s3676_s12 }
  0xb1   : > { %s3678_s18 = scalar_lea.vmem %s3677_s12, 4096  ;;  %p3679_p6 = scmp.lt.s32.totalorder %s4050_s11, %s3677_s12 }
  0xb2   : > { %p3674_p1 = pnand %p3672_p10, %p3658_p7  ;;  %p3680_p11 = scmp.lt.s32.totalorder %s3678_s18, %s3671_s13 }
  0xb4   : > { %p3675_p8 = pneg %p3674_p1  ;;  %p3681_p12 = por %p3680_p11, %p3679_p6 }
  0xb6   : > { %p3682_p13 = pnand %p3681_p12, %p3675_p8 }
  0xb8   : > { %3685 = shalt.err (!%p3682_p13)
}
  0xb9   : > { %s5109_s10 = smov 128   ;;  %p5110_p7 = scmp.ne.s32.totalorder %s5098_s8, 0 }
  0xba   : > { %3197 = dma.hbm_to_vmem [thread:$0]  (!%p4054_p9), %s4048_s23, 2048, %s4050_s11, %s4058_s9, %s5109_s10, %s5109_s10, %s3770_s28  }
  0xbb   : > { %321 = sbr.rel (%p5110_p7) target bundleno = 1746 (0x6d2), region = 48 }
  0xc2   : > { %s4092_s20 = sand.u32 1, %s3756_s25  }
  0xc3   : > { %s2564_s22 = sshll.u32 %s4092_s20, 7  ;;  %s324_s13 = scalar_lea.sflag [#allocation3], %s4092_s20 }
  0xc4   : > { %s4098_s14 = scalar_lea.vmem [#allocation2], %s2564_s22 }
  0xc5   : > { %3731 = dma.done.wait (%p4029_p5), %s324_s13, 2048  }
  0xc6   : > { %3733 = vsyncadd (%p4029_p5), %s324_s13, 4294965248  ;;  %p5111_p6 = scmp.eq.s32.totalorder %s3845_s30, 0 }
  0xc8   : > { %3735 = dma.done.wait (%p5111_p6), [#allocation6], 2176   ;;  %p5112_p8 = pmov %p5111_p6 }
  0xc9   : > { %p5113_p9 = pmov %p5111_p6 }
  0xca   : > { %3737 = vsyncadd (%p5112_p8), [#allocation6], 4294965120 }
  0xcb   : > { %3739 = dma.done.wait (%p5113_p9), [#allocation9], 2048   ;;  %p5114_p3 = pmov %p5111_p6 }
  0xcd   : > { %3741 = vsyncadd (%p5114_p3), [#allocation9], 4294965248  ;;  %p5115_p0 = pmov %p5114_p3 }
  0xcf   : > { %3743 = dma.done.wait (%p5115_p0), [#allocation12], 3072   ;;  %p5116_p2 = pmov %p5115_p0 }
  0xd0   : > { %v401_v0 = vld [vmem:[#allocation5] sm:$0xff]  ;;  %v402_v1 = vld [vmem:[#allocation5 + $0x8] sm:$0xff]  ;;  %v403_v2 = vld [vmem:[#allocation5 + $0x10] sm:$0xff]  ;;  %s3778_s8 = smov 32   ;;  %s3779_s28 = smov 64  }
  0xd1   : > { %3745 = vsyncadd (%p5116_p2), [#allocation12], 4294964224  ;;  %v3083_v3 = vpack.c.bf16 %v402_v1, %v401_v0  ;;  %v404_v4 = vld [vmem:[#allocation5 + $0x18] sm:$0xff]  ;;  %v405_v6 = vld [vmem:[#allocation5 + $0x20] sm:$0xff]  ;;  %s3780_s16 = smov 96   ;;  %s4966_s23 = scalar_lea.vmem [#allocation14], %s2564_s22 }
  0xd2   : > { %v3087_v5 = vpack.c.bf16 %v404_v4, %v403_v2  ;;  %v406_v7 = vld [vmem:[#allocation5 + $0x28] sm:$0xff]  ;;  %v4117_v9 = vld [vmem:[%s4098_s14] sm:$0xff]  ;;  %v407_v10 = vld [vmem:[#allocation5 + $0x30] sm:$0xff]  ;;  %s2618_s11 = sshll.u32 %s3845_s30, 11  ;;  %s2421_s9 = sshll.u32 %s4966_s23, 4  ;;  %s5037_s9 = int_to_ptr.vmem [resolvable:$true] %s2421_s9 }
  0xd3   : > { %3084 = vmatprep.subr.bf16.mxu0 %v3083_v3  ;;  %3116 = vmatprep.subr.bf16.mxu1 %v3083_v3  ;;  %v3091_v8 = vpack.c.bf16 %v406_v7, %v405_v6  ;;  %v408_v11 = vld [vmem:[#allocation5 + $0x38] sm:$0xff]  ;;  %v563_v12 = vmul.f32 %v4117_v9, %v4117_v9  ;;  %v409_v14 = vld [vmem:[#allocation5 + $0x40] sm:$0xff]  ;;  %v410_v15 = vld [vmem:[#allocation5 + $0x48] sm:$0xff]  ;;  %s5035_s18 = scalar_lea.hbm %s5089_s7, %s2618_s11  ;;  %s2408_s30 = scalar_lea.sflag [#allocation4], %s4092_s20 }
  0xd4   : > { %3086 = vmatpush3.bf16.msra.mxu0 %v3083_v3  ;;  %3118 = vmatpush3.bf16.msra.mxu1 %v3083_v3  ;;  %v3095_v13 = vpack.c.bf16 %v408_v11, %v407_v10  ;;  %v411_v16 = vld [vmem:[#allocation5 + $0x50] sm:$0xff]  ;;  %v412_v17 = vld [vmem:[#allocation5 + $0x58] sm:$0xff]  ;;  %v3099_v18 = vpack.c.bf16 %v410_v15, %v409_v14  ;;  %v413_v19 = vld [vmem:[#allocation5 + $0x60] sm:$0xff]  ;;  %s3686_s10 = scalar_lea.vmem %s5037_s9, 2048  ;;  %p5123_p4 = scmp.ne.s32.totalorder %s5106_s15, 0 }
  0xd5   : > { %3088 = vmatprep.subr.bf16.mxu0 %v3087_v5  ;;  %3120 = vmatprep.subr.bf16.mxu1 %v3087_v5  ;;  %v414_v20 = vld [vmem:[#allocation5 + $0x68] sm:$0xff]  ;;  %v3103_v21 = vpack.c.bf16 %v412_v17, %v411_v16  ;;  %v415_v22 = vld [vmem:[#allocation5 + $0x70] sm:$0xff]  ;;  %v416_v23 = vld [vmem:[#allocation5 + $0x78] sm:$0xff]  ;;  %v820_v17 = vlaneseq  ;;  %p3687_p5 = scmp.ne.s32.totalorder %s5037_s9, %s3686_s10  ;;  %s3781_s22 = smov [#allocation14]  }
  0xd6   : > { %2811 = vmatprep.mubr.f32.mxu0 %v4117_v9  ;;  %2867 = vmatprep.mubr.f32.mxu1 %v563_v12  ;;  %v3107_v24 = vpack.c.bf16 %v414_v20, %v413_v19  ;;  %v3111_v25 = vpack.c.bf16 %v416_v23, %v415_v22  ;;  %v4123_v26 = vld [vmem:[%s4098_s14 + $0x8] sm:$0xff]  ;;  %v4126_v27 = vld [vmem:[%s4098_s14 + $0x10] sm:$0xff]  ;;  %v4131_v30 = vld [vmem:[%s4098_s14 + $0x18] sm:$0xff]  ;;  %s3690_s13 = sshll.u32 %s3781_s22, 4  ;;  %s3691_s13 = int_to_ptr.vmem [resolvable:$false] %s3690_s13 }
  0xd7   : > { %v3264_v28 = vld [vmem:[#allocation8] sm:$0xff]   ;;  %v564_v29 = vmul.f32 %v4123_v26, %v4123_v26  ;;  %v565_v31 = vmul.f32 %v4126_v27, %v4126_v27  ;;  %v4136_v32 = vld [vmem:[%s4098_s14 + $0x20] sm:$0xff]  ;;  %v566_v33 = vmul.f32 %v4131_v30, %v4131_v30  ;;  %v4148_v36 = vld [vmem:[%s4098_s14 + $0x30] sm:$0xff]  ;;  %p3688_p10 = pnand %p3687_p5, %p5123_p4  ;;  %p3693_p11 = scmp.lt.s32.totalorder %s5037_s9, %s3691_s13 }
  0xd8   : > { %3090 = vmatpush3.bf16.msra.mxu0 %v3087_v5  ;;  %3122 = vmatpush3.bf16.msra.mxu1 %v3087_v5  ;;  %v4143_v34 = vld [vmem:[%s4098_s14 + $0x28] sm:$0xff]  ;;  %v567_v35 = vmul.f32 %v4136_v32, %v4136_v32  ;;  %v4155_v38 = vld [vmem:[%s4098_s14 + $0x38] sm:$0xff]  ;;  %v569_v39 = vmul.f32 %v4148_v36, %v4148_v36  ;;  %v4160_v40 = vld [vmem:[%s4098_s14 + $0x40] sm:$0xff] }
  0xd9   : > { %3092 = vmatprep.subr.bf16.mxu0 %v3091_v8  ;;  %3124 = vmatprep.subr.bf16.mxu1 %v3091_v8  ;;  %v568_v37 = vmul.f32 %v4143_v34, %v4143_v34  ;;  %v570_v41 = vmul.f32 %v4155_v38, %v4155_v38  ;;  %v4167_v42 = vld [vmem:[%s4098_s14 + $0x48] sm:$0xff]  ;;  %v571_v43 = vmul.f32 %v4160_v40, %v4160_v40  ;;  %v4172_v44 = vld [vmem:[%s4098_s14 + $0x50] sm:$0xff]  ;;  %v4179_v46 = vld [vmem:[%s4098_s14 + $0x58] sm:$0xff]  ;;  %p3689_p1 = pneg %p3688_p10 }
  0xda   : > { %v572_v45 = vmul.f32 %v4167_v42, %v4167_v42  ;;  %v573_v47 = vmul.f32 %v4172_v44, %v4172_v44  ;;  %v4184_v48 = vld [vmem:[%s4098_s14 + $0x60] sm:$0xff]  ;;  %v574_v49 = vmul.f32 %v4179_v46, %v4179_v46  ;;  %v4191_v50 = vld [vmem:[%s4098_s14 + $0x68] sm:$0xff]  ;;  %v4196_v52 = vld [vmem:[%s4098_s14 + $0x70] sm:$0xff] }
  0xdb   : > { %v575_v51 = vmul.f32 %v4184_v48, %v4184_v48  ;;  %v576_v53 = vmul.f32 %v4191_v50, %v4191_v50  ;;  %v4203_v54 = vld [vmem:[%s4098_s14 + $0x78] sm:$0xff]  ;;  %v577_v55 = vmul.f32 %v4196_v52, %v4196_v52  ;;  %v3265_v57 = vld [vmem:[#allocation8 + $0x8] sm:$0xff]   ;;  %v3267_v59 = vld [vmem:[#allocation8 + $0x18] sm:$0xff]  }
  0xdc   : > { %3094 = vmatpush3.bf16.msra.mxu0 %v3091_v8  ;;  %3126 = vmatpush3.bf16.msra.mxu1 %v3091_v8  ;;  %v578_v56 = vmul.f32 %v4203_v54, %v4203_v54  ;;  %v3266_v58 = vld [vmem:[#allocation8 + $0x10] sm:$0xff]   ;;  %v3268_v60 = vld [vmem:[#allocation8 + $0x20] sm:$0xff]   ;;  %v3269_v61 = vld [vmem:[#allocation8 + $0x28] sm:$0xff]  }
  0xdd   : > { %3096 = vmatprep.subr.bf16.mxu0 %v3095_v13  ;;  %3128 = vmatprep.subr.bf16.mxu1 %v3095_v13  ;;  %v3270_v62 = vld [vmem:[#allocation8 + $0x30] sm:$0xff]   ;;  %v3271_v63 = vld [vmem:[#allocation8 + $0x38] sm:$0xff]   ;;  %v3272_v0 = vld [vmem:[#allocation10] sm:$0xff]  }
  0xde   : > { %v3273_v1 = vld [vmem:[#allocation10 + $0x8] sm:$0xff]   ;;  %v3274_v2 = vld [vmem:[#allocation10 + $0x10] sm:$0xff]   ;;  %v3275_v3 = vld [vmem:[#allocation10 + $0x18] sm:$0xff]  }
  0xdf   : > { %v3276_v4 = vld [vmem:[#allocation10 + $0x20] sm:$0xff]   ;;  %v3277_v5 = vld [vmem:[#allocation10 + $0x28] sm:$0xff]  }
  0xe0   : > { %3098 = vmatpush3.bf16.msra.mxu0 %v3095_v13  ;;  %3130 = vmatpush3.bf16.msra.mxu1 %v3095_v13 }
  0xe1   : > { %3100 = vmatprep.subr.bf16.mxu0 %v3099_v18  ;;  %3132 = vmatprep.subr.bf16.mxu1 %v3099_v18 }
  0xe4   : > { %3102 = vmatpush3.bf16.msra.mxu0 %v3099_v18  ;;  %3134 = vmatpush3.bf16.msra.mxu1 %v3099_v18 }
  0xe5   : > { %3104 = vmatprep.subr.bf16.mxu0 %v3103_v21  ;;  %3136 = vmatprep.subr.bf16.mxu1 %v3103_v21 }
  0xe8   : > { %3106 = vmatpush3.bf16.msra.mxu0 %v3103_v21  ;;  %3138 = vmatpush3.bf16.msra.mxu1 %v3103_v21 }
  0xe9   : > { %3108 = vmatprep.subr.bf16.mxu0 %v3107_v24  ;;  %3140 = vmatprep.subr.bf16.mxu1 %v3107_v24 }
  0xec   : > { %3110 = vmatpush3.bf16.msra.mxu0 %v3107_v24  ;;  %3142 = vmatpush3.bf16.msra.mxu1 %v3107_v24 }
  0xed   : > { %3112 = vmatprep.subr.bf16.mxu0 %v3111_v25  ;;  %3144 = vmatprep.subr.bf16.mxu1 %v3111_v25 }
  0xf0   : > { %3114 = vmatpush3.bf16.msra.mxu0 %v3111_v25  ;;  %3146 = vmatpush3.bf16.msra.mxu1 %v3111_v25  ;;  %v4228_v25 = vshrl.u32 %v820_v17, 7 }
  0xf1   : > { %2891 = vmatprep.subr.bf16.mxu0 %v3264_v28  ;;  %2923 = vmatprep.subr.bf16.mxu1 %v3272_v0 }
  0xf3   : > { %2812 = vmatmul.mubr.f32.vlgmr.msra.gmra.mrb[0].mxu0 %v4123_v26  ;;  %2868 = vmatmul.mubr.f32.vlgmr.msra.gmra.mrb[0].mxu1 %v564_v29 }
  0xf4   : > { %2814 = vmatprep.mubr.f32.mxu0 %v4126_v27  ;;  %2870 = vmatprep.mubr.f32.mxu1 %v565_v31 }
  0xf5   : > { %2892 = vmatpush3.bf16.msra.mxu0 %v3264_v28  ;;  %2924 = vmatpush3.bf16.msra.mxu1 %v3272_v0 }
  0xf6   : > { %2893 = vmatprep.subr.bf16.mxu0 %v3265_v57  ;;  %2925 = vmatprep.subr.bf16.mxu1 %v3273_v1 }
  0xf7   : > { %2815 = vmatmul.mubr.f32.gmra.mrb[2].mxu0 %v4131_v30  ;;  %2871 = vmatmul.mubr.f32.gmra.mrb[2].mxu1 %v566_v33 }
  0xf8   : > { %2817 = vmatprep.mubr.f32.mxu0 %v4136_v32  ;;  %2873 = vmatprep.mubr.f32.mxu1 %v567_v35 }
  0xf9   : > { %2894 = vmatpush3.bf16.msra.mxu0 %v3265_v57  ;;  %2926 = vmatpush3.bf16.msra.mxu1 %v3273_v1 }
  0xfa   : > { %2895 = vmatprep.subr.bf16.mxu0 %v3266_v58  ;;  %2927 = vmatprep.subr.bf16.mxu1 %v3274_v2 }
  0xfb   : > { %2818 = vmatmul.mubr.f32.gmra.mrb[4].mxu0 %v4143_v34  ;;  %2874 = vmatmul.mubr.f32.gmra.mrb[4].mxu1 %v568_v37 }
  0xfc   : > { %2820 = vmatprep.mubr.f32.mxu0 %v4148_v36  ;;  %2876 = vmatprep.mubr.f32.mxu1 %v569_v39 }
  0xfd   : > { %2896 = vmatpush3.bf16.msra.mxu0 %v3266_v58  ;;  %2928 = vmatpush3.bf16.msra.mxu1 %v3274_v2 }
  0xfe   : > { %2897 = vmatprep.subr.bf16.mxu0 %v3267_v59  ;;  %2929 = vmatprep.subr.bf16.mxu1 %v3275_v3 }
  0xff   : > { %2821 = vmatmul.mubr.f32.gmra.mrb[6].mxu0 %v4155_v38  ;;  %2877 = vmatmul.mubr.f32.gmra.mrb[6].mxu1 %v570_v41 }
 0x100   : > { %2823 = vmatprep.mubr.f32.mxu0 %v4160_v40  ;;  %2879 = vmatprep.mubr.f32.mxu1 %v571_v43 }
 0x101   : > { %2898 = vmatpush3.bf16.msra.mxu0 %v3267_v59  ;;  %2930 = vmatpush3.bf16.msra.mxu1 %v3275_v3 }
 0x102   : > { %2899 = vmatprep.subr.bf16.mxu0 %v3268_v60  ;;  %2931 = vmatprep.subr.bf16.mxu1 %v3276_v4 }
 0x103   : > { %2824 = vmatmul.mubr.f32.gmra.mrb[8].mxu0 %v4167_v42  ;;  %2880 = vmatmul.mubr.f32.gmra.mrb[8].mxu1 %v572_v45 }
 0x104   : > { %2826 = vmatprep.mubr.f32.mxu0 %v4172_v44  ;;  %2882 = vmatprep.mubr.f32.mxu1 %v573_v47  ;;  %v822_v47 = vsub.s32 0, %v4228_v25 }
 0x105   : > { %2900 = vmatpush3.bf16.msra.mxu0 %v3268_v60  ;;  %2932 = vmatpush3.bf16.msra.mxu1 %v3276_v4 }
 0x106   : > { %2901 = vmatprep.subr.bf16.mxu0 %v3269_v61  ;;  %2933 = vmatprep.subr.bf16.mxu1 %v3277_v5 }
 0x107   : > { %2827 = vmatmul.mubr.f32.gmra.mrb[10].mxu0 %v4179_v46  ;;  %2883 = vmatmul.mubr.f32.gmra.mrb[10].mxu1 %v574_v49 }
 0x108   : > { %2829 = vmatprep.mubr.f32.mxu0 %v4184_v48  ;;  %2885 = vmatprep.mubr.f32.mxu1 %v575_v51 }
 0x109   : > { %2902 = vmatpush3.bf16.msra.mxu0 %v3269_v61  ;;  %2934 = vmatpush3.bf16.msra.mxu1 %v3277_v5 }
 0x10a   : > { %2903 = vmatprep.subr.bf16.mxu0 %v3270_v62 }
 0x10b   : > { %2830 = vmatmul.mubr.f32.gmra.mrb[12].mxu0 %v4191_v50  ;;  %2886 = vmatmul.mubr.f32.gmra.mrb[12].mxu1 %v576_v53 }
 0x10c   : > { %2832 = vmatprep.mubr.f32.mxu0 %v4196_v52  ;;  %2888 = vmatprep.mubr.f32.mxu1 %v577_v55  ;;  %v4241_v55 = vld [vmem:[#allocation7] sm:$0xff] }
 0x10d   : > { %2904 = vmatpush3.bf16.msra.mxu0 %v3270_v62  ;;  %v842_v62 = vsub.s32 1, %v4228_v25  ;;  %v4253_v1 = vrot.slane %v4241_v55, %v822_v47 }
 0x10e   : > { %2905 = vmatprep.subr.bf16.mxu0 %v3271_v63 }
 0x10f   : > { %2833 = vmatmul.mubr.f32.gmra.mrb[14].mxu0 %v4203_v54  ;;  %2889 = vmatmul.mubr.f32.gmra.mrb[14].mxu1 %v578_v56  ;;  %v4266_v17 = vrot.slane %v4241_v55, %v842_v62 }
 0x111   : > { %2906 = vmatpush3.bf16.msra.mxu0 %v3271_v63 }
 0x1c6   : > { %v4212_v6 = vpop.f32.mrb[0].mxu0  ;;  %v2869_v7 = vpop.f32.mrb[0].mxu1 }
 0x1c7   : > { %v725_v8 = vmul.f32 %v4212_v6, %v4212_v6  ;;  %v4216_v10 = vpop.f32.mrb[1].mxu0  ;;  %v645_v11 = vpop.f32.mrb[1].mxu1  ;;  %v757_v0 = vsub.f32 %v4123_v26, %v4212_v6 }
 0x1c8   : > { %v724_v12 = vmul.f32 %v4216_v10, %v4216_v10 }
 0x1c9   : > { %v741_v13 = vsub.f32 %v2869_v7, %v725_v8  ;;  %v756_v7 = vsub.f32 %v4117_v9, %v4216_v10  ;;  %v1457_v10 = vsub.s32 4, %v4228_v25 }
 0x1ca   : > { %v740_v14 = vsub.f32 %v645_v11, %v724_v12  ;;  %v4220_v15 = vpop.f32.mrb[2].mxu0  ;;  %v2872_v16 = vpop.f32.mrb[2].mxu1 }
 0x1cb   : > { %v773_v18 = vadd.f32 1e-05, %v741_v13  ;;  %v727_v19 = vmul.f32 %v4220_v15, %v4220_v15  ;;  %v4224_v20 = vpop.f32.mrb[3].mxu0  ;;  %v655_v21 = vpop.f32.mrb[3].mxu1 }
 0x1cc   : > { %v772_v22 = vadd.f32 1e-05, %v740_v14  ;;  %v726_v23 = vmul.f32 %v4224_v20, %v4224_v20 }
 0x1cd   : > { %3312 = vrsqrt.f32 %v773_v18  ;;  %v743_v24 = vsub.f32 %v2872_v16, %v727_v19  ;;  %v759_v19 = vsub.f32 %v4131_v30, %v4220_v15 }
 0x1ce   : > { %3314 = vrsqrt.f32 %v772_v22  ;;  %v742_v28 = vsub.f32 %v655_v21, %v726_v23  ;;  %v4230_v29 = vpop.f32.mrb[4].mxu0  ;;  %v2875_v31 = vpop.f32.mrb[4].mxu1 }
 0x1cf   : > { %v775_v33 = vadd.f32 1e-05, %v743_v24  ;;  %v729_v35 = vmul.f32 %v4230_v29, %v4230_v29  ;;  %v4234_v37 = vpop.f32.mrb[5].mxu0  ;;  %v665_v39 = vpop.f32.mrb[5].mxu1 }
 0x1d0   : > { %v774_v41 = vadd.f32 1e-05, %v742_v28  ;;  %v728_v43 = vmul.f32 %v4234_v37, %v4234_v37 }
 0x1d1   : > { %3316 = vrsqrt.f32 %v775_v33  ;;  %v745_v45 = vsub.f32 %v2875_v31, %v729_v35  ;;  %v758_v31 = vsub.f32 %v4126_v27, %v4224_v20 }
 0x1d2   : > { %3318 = vrsqrt.f32 %v774_v41  ;;  %v744_v49 = vsub.f32 %v665_v39, %v728_v43  ;;  %v4239_v51 = vpop.f32.mrb[6].mxu0  ;;  %v2878_v53 = vpop.f32.mrb[6].mxu1 }
 0x1d3   : > { %v777_v56 = vadd.f32 1e-05, %v745_v45  ;;  %v731_v57 = vmul.f32 %v4239_v51, %v4239_v51  ;;  %v4245_v58 = vpop.f32.mrb[7].mxu0  ;;  %v675_v59 = vpop.f32.mrb[7].mxu1  ;;  %v761_v45 = vsub.f32 %v4143_v34, %v4230_v29 }
 0x1d4   : > { %v776_v60 = vadd.f32 1e-05, %v744_v49  ;;  %v730_v61 = vmul.f32 %v4245_v58, %v4245_v58 }
 0x1d5   : > { %v747_v63 = vsub.f32 %v2878_v53, %v731_v57 }
 0x1d6   : > { %3320 = vrsqrt.f32 %v776_v60  ;;  %v746_v2 = vsub.f32 %v675_v59, %v730_v61  ;;  %v4255_v3 = vpop.f32.mrb[8].mxu0  ;;  %v2881_v4 = vpop.f32.mrb[8].mxu1  ;;  %v760_v61 = vsub.f32 %v4136_v32, %v4234_v37 }
 0x1d7   : > { %v3313_v5 = vpop.eup %3312  ;;  %3322 = vrsqrt.f32 %v777_v56  ;;  %v779_v8 = vadd.f32 1e-05, %v747_v63  ;;  %v733_v11 = vmul.f32 %v4255_v3, %v4255_v3  ;;  %v4261_v12 = vpop.f32.mrb[9].mxu0 }
 0x1d8   : > { %v685_v26 = vpop.f32.mrb[9].mxu1  ;;  %v3315_v6 = vpop.eup %3314  ;;  %v778_v13 = vadd.f32 1e-05, %v746_v2  ;;  %v732_v14 = vmul.f32 %v4261_v12, %v4261_v12  ;;  %v805_v16 = vmul.f32 %v3313_v5, %v757_v0  ;;  %v763_v5 = vsub.f32 %v4155_v38, %v4239_v51 }
 0x1d9   : > { %3324 = vrsqrt.f32 %v779_v8  ;;  %v749_v18 = vsub.f32 %v2881_v4, %v733_v11  ;;  %v804_v9 = vmul.f32 %v3315_v6, %v756_v7  ;;  %v762_v7 = vsub.f32 %v4148_v36, %v4245_v58 }
 0x1da   : > { %3326 = vrsqrt.f32 %v778_v13  ;;  %v4271_v21 = vpop.f32.mrb[10].mxu0  ;;  %v748_v22 = vsub.f32 %v685_v26, %v732_v14  ;;  %v2884_v23 = vpop.f32.mrb[10].mxu1  ;;  %v825_v24 = vmul.f32 %v4253_v1, %v805_v16  ;;  %v765_v38 = vsub.f32 %v4167_v42, %v4255_v3 }
 0x1db   : > { %v3317_v28 = vpop.eup %3316  ;;  %v735_v33 = vmul.f32 %v4271_v21, %v4271_v21  ;;  %v781_v35 = vadd.f32 1e-05, %v749_v18  ;;  %v4278_v39 = vpop.f32.mrb[11].mxu0  ;;  %v824_v30 = vmul.f32 %v4253_v1, %v804_v9  ;;  %v764_v16 = vsub.f32 %v4160_v40, %v4261_v12 }
 0x1dc   : > { %v695_v41 = vpop.f32.mrb[11].mxu1  ;;  %v3319_v15 = vpop.eup %3318  ;;  %v807_v43 = vmul.f32 %v3317_v28, %v759_v19  ;;  %v734_v47 = vmul.f32 %v4278_v39, %v4278_v39  ;;  %v780_v49 = vadd.f32 1e-05, %v748_v22  ;;  %v4290_v59 = vadd.f32 %v4266_v17, %v825_v24 }
 0x1dd   : > { %v806_v53 = vmul.f32 %v3319_v15, %v758_v31  ;;  %3328 = vrsqrt.f32 %v781_v35  ;;  %v751_v27 = vsub.f32 %v2884_v23, %v735_v33  ;;  %v4286_v20 = vadd.f32 %v4266_v17, %v824_v30 }
 0x1de   : > { %v827_v56 = vmul.f32 %v4253_v1, %v807_v43  ;;  %3330 = vrsqrt.f32 %v780_v49  ;;  %v750_v57 = vsub.f32 %v695_v41, %v734_v47  ;;  %v4292_v60 = vpop.f32.mrb[12].mxu0  ;;  %v2887_v34 = vpop.f32.mrb[12].mxu1  ;;  %v767_v23 = vsub.f32 %v4179_v46, %v4271_v21 }
 0x1df   : > { %v826_v29 = vmul.f32 %v4253_v1, %v806_v53  ;;  %v783_v62 = vadd.f32 1e-05, %v751_v27  ;;  %v737_v63 = vmul.f32 %v4292_v60, %v4292_v60  ;;  %v4299_v0 = vpop.f32.mrb[13].mxu0  ;;  %v705_v2 = vpop.f32.mrb[13].mxu1  ;;  %v860_v11 = vpack.c.bf16 %v4290_v59, %v4286_v20 }
 0x1e0   : > { %v3321_v4 = vpop.eup %3320  ;;  %v782_v8 = vadd.f32 1e-05, %v750_v57  ;;  %v4311_v37 = vadd.f32 %v4266_v17, %v827_v56  ;;  %v736_v6 = vmul.f32 %v4299_v0, %v4299_v0  ;;  %v766_v57 = vsub.f32 %v4172_v44, %v4278_v39 }
 0x1e1   : > { %v3323_v26 = vpop.eup %3322  ;;  %3332 = vrsqrt.f32 %v783_v62  ;;  %v4308_v32 = vadd.f32 %v4266_v17, %v826_v29  ;;  %2907 = vmatprep.mubr.bf16.mxu0 %v860_v11  ;;  %v753_v51 = vsub.f32 %v2887_v34, %v737_v63  ;;  %v808_v13 = vmul.f32 %v3321_v4, %v760_v61 }
 0x1e2   : > { %3334 = vrsqrt.f32 %v782_v8  ;;  %v4317_v36 = vpop.f32.mrb[14].mxu0  ;;  %v2890_v58 = vpop.f32.mrb[14].mxu1  ;;  %v752_v42 = vsub.f32 %v705_v2, %v736_v6  ;;  %v809_v31 = vmul.f32 %v3323_v26, %v761_v45  ;;  %v4356_v44 = vrot.slane %v4241_v55, %v1457_v10 }
 0x1e3   : > { %v3325_v14 = vpop.eup %3324  ;;  %v861_v18 = vpack.c.bf16 %v4311_v37, %v4308_v32  ;;  %v739_v9 = vmul.f32 %v4317_v36, %v4317_v36  ;;  %v4325_v19 = vpop.f32.mrb[15].mxu0  ;;  %v785_v24 = vadd.f32 1e-05, %v753_v51  ;;  %v828_v33 = vmul.f32 %v4253_v1, %v808_v13 }
 0x1e4   : > { %v715_v3 = vpop.f32.mrb[15].mxu1  ;;  %v3327_v22 = vpop.eup %3326  ;;  %v738_v28 = vmul.f32 %v4325_v19, %v4325_v19  ;;  %v784_v40 = vadd.f32 1e-05, %v752_v42  ;;  %v829_v41 = vmul.f32 %v4253_v1, %v809_v31  ;;  %v811_v15 = vmul.f32 %v3325_v14, %v763_v5 }
 0x1e5   : > { %2908 = vmatmul.mubr.bf16.vlgmr.msra.gmra.mrb[16].mxu0 %v861_v18  ;;  %v755_v12 = vsub.f32 %v2890_v58, %v739_v9  ;;  %v810_v35 = vmul.f32 %v3327_v22, %v762_v7  ;;  %3336 = vrsqrt.f32 %v785_v24  ;;  %v4334_v46 = vadd.f32 %v4266_v17, %v828_v33 }
 0x1e6   : > { %v754_v30 = vsub.f32 %v715_v3, %v738_v28  ;;  %3338 = vrsqrt.f32 %v784_v40  ;;  %v4338_v49 = vadd.f32 %v4266_v17, %v829_v41  ;;  %v831_v27 = vmul.f32 %v4253_v1, %v811_v15 }
 0x1e7   : > { %v3329_v43 = vpop.eup %3328  ;;  %v787_v47 = vadd.f32 1e-05, %v755_v12  ;;  %v830_v21 = vmul.f32 %v4253_v1, %v810_v35  ;;  %v769_v8 = vsub.f32 %v4191_v50, %v4292_v60  ;;  %v771_v60 = vsub.f32 %v4203_v54, %v4317_v36 }
 0x1e8   : > { %v3331_v45 = vpop.eup %3330  ;;  %v786_v53 = vadd.f32 1e-05, %v754_v30  ;;  %v813_v56 = vmul.f32 %v3329_v43, %v765_v38  ;;  %v862_v61 = vpack.c.bf16 %v4338_v49, %v4334_v46  ;;  %v4349_v62 = vadd.f32 %v4266_v17, %v831_v27  ;;  %v3288_v27 = vld [vmem:[#allocation11 + $0x24] ss:$8 sps:$4 sm:$0xff]  }
 0x1e9   : > { %3340 = vrsqrt.f32 %v787_v47  ;;  %v4344_v34 = vadd.f32 %v4266_v17, %v830_v21  ;;  %v812_v29 = vmul.f32 %v3331_v45, %v764_v16  ;;  %v768_v38 = vsub.f32 %v4184_v48, %v4299_v0  ;;  %v3278_v47 = vld [vmem:[#allocation10 + $0x30] sm:$0xff]   ;;  %v3280_v21 = vld [vmem:[#allocation11] ss:$8 sps:$4 sm:$0xff]   ;;  %v3282_v45 = vld [vmem:[#allocation11 + $0x4] ss:$8 sps:$4 sm:$0xff]  }
 0x1ea   : > { %3342 = vrsqrt.f32 %v786_v53  ;;  %v833_v4 = vmul.f32 %v4253_v1, %v813_v56  ;;  %2911 = vmatprep.mubr.bf16.mxu0 %v862_v61  ;;  %v770_v48 = vsub.f32 %v4196_v52, %v4325_v19  ;;  %2935 = vmatprep.subr.bf16.mxu1 %v3278_v47  ;;  %v3285_v53 = vld [vmem:[#allocation11 + $0x14] ss:$8 sps:$4 sm:$0xff]   ;;  %v3286_v56 = vld [vmem:[#allocation11 + $0x20] ss:$8 sps:$4 sm:$0xff]   ;;  %v3294_v61 = vld [vmem:[#allocation11 + $0x44] ss:$8 sps:$4 sm:$0xff]  }
 0x1eb   : > { %v3333_v63 = vpop.eup %3332  ;;  %v832_v2 = vmul.f32 %v4253_v1, %v812_v29  ;;  %v863_v39 = vpack.c.bf16 %v4349_v62, %v4344_v34  ;;  %2936 = vmatpush3.bf16.msra.mxu1 %v3278_v47  ;;  %1326 = vmatprep.subr.bf16.mxu0 %v3282_v45  ;;  %v3289_v29 = vld [vmem:[#allocation11 + $0x30] ss:$8 sps:$4 sm:$0xff]  }
 0x1ec   : > { %v3335_v5 = vpop.eup %3334  ;;  %v815_v7 = vmul.f32 %v3333_v63, %v767_v23  ;;  %v853_v26 = vadd.f32 %v4266_v17, %v833_v4  ;;  %1327 = vmatpush1.bf16.msra.mxu0 %v3280_v21  ;;  %v3292_v63 = vld [vmem:[#allocation11 + $0x40] ss:$8 sps:$4 sm:$0xff]   ;;  %v3295_v4 = vld [vmem:[#allocation11 + $0x50] ss:$8 sps:$4 sm:$0xff]  }
 0x1ed   : > { %v4363_v11 = vadd.f32 %v4266_v17, %v832_v2  ;;  %v814_v6 = vmul.f32 %v3335_v5, %v766_v57  ;;  %2912 = vmatmul.mubr.bf16.gmra.mrb[20].mxu0 %v863_v39  ;;  %1328 = vmatprep.subr.bf16.mxu0 %v3285_v53  ;;  %v3291_v57 = vld [vmem:[#allocation11 + $0x34] ss:$8 sps:$4 sm:$0xff]   ;;  %v3300_v5 = vld [vmem:[#allocation11 + $0x64] ss:$8 sps:$4 sm:$0xff]   ;;  %v3298_v39 = vld [vmem:[#allocation11 + $0x60] ss:$8 sps:$4 sm:$0xff]  }
 0x1ee   : > { %v835_v10 = vmul.f32 %v4253_v1, %v815_v7  ;;  %v4371_v58 = vmul.f32 %v4356_v44, %v853_v26  ;;  %v3297_v2 = vld [vmem:[#allocation11 + $0x54] ss:$8 sps:$4 sm:$0xff]   ;;  %v886_v7 = vsub.s32 2, %v4228_v25 }
 0x1ef   : > { %v864_v51 = vpack.c.bf16 %v853_v26, %v4363_v11  ;;  %v834_v13 = vmul.f32 %v4253_v1, %v814_v6  ;;  %v3337_v50 = vpop.eup %3336 }
 0x1f0   : > { %v4377_v14 = vadd.f32 %v4266_v17, %v835_v10  ;;  %v3339_v16 = vpop.eup %3338  ;;  %v817_v18 = vmul.f32 %v3337_v50, %v769_v8  ;;  %v887_v8 = vrot.slane %v4241_v55, %v886_v7 }
 0x1f1   : > { %2915 = vmatprep.mubr.bf16.mxu0 %v864_v51  ;;  %v4382_v0 = vadd.f32 %v4266_v17, %v834_v13  ;;  %v816_v9 = vmul.f32 %v3339_v16, %v768_v38 }
 0x1f2   : > { %v837_v22 = vmul.f32 %v4253_v1, %v817_v18 }
 0x1f3   : > { %v3341_v42 = vpop.eup %3340  ;;  %v865_v3 = vpack.c.bf16 %v4377_v14, %v4382_v0  ;;  %v836_v36 = vmul.f32 %v4253_v1, %v816_v9 }
 0x1f4   : > { %v3343_v54 = vpop.eup %3342  ;;  %v819_v23 = vmul.f32 %v3341_v42, %v771_v60  ;;  %v857_v24 = vadd.f32 %v4266_v17, %v837_v22 }
 0x1f5   : > { %v818_v28 = vmul.f32 %v3343_v54, %v770_v48  ;;  %2916 = vmatmul.mubr.bf16.gmra.mrb[24].mxu0 %v865_v3  ;;  %v856_v52 = vadd.f32 %v4266_v17, %v836_v36 }
 0x1f6   : > { %v839_v19 = vmul.f32 %v4253_v1, %v819_v23  ;;  %v4392_v31 = vmul.f32 %v4356_v44, %v857_v24 }
 0x1f7   : > { %v838_v40 = vmul.f32 %v4253_v1, %v818_v28  ;;  %v866_v12 = vpack.c.bf16 %v857_v24, %v856_v52  ;;  %v4396_v33 = vmul.f32 %v4356_v44, %v856_v52  ;;  %v3279_v1 = vld [vmem:[#allocation10 + $0x38] sm:$0xff]  }
 0x1f8   : > { %v859_v35 = vadd.f32 %v4266_v17, %v839_v19  ;;  %2937 = vmatprep.subr.bf16.mxu1 %v3279_v1 }
 0x1f9   : > { %v858_v41 = vadd.f32 %v4266_v17, %v838_v40  ;;  %2919 = vmatprep.mubr.bf16.mxu0 %v866_v12  ;;  %2938 = vmatpush3.bf16.msra.mxu1 %v3279_v1  ;;  %v3283_v17 = vld [vmem:[#allocation11 + $0x10] ss:$8 sps:$4 sm:$0xff]  }
 0x1fa   : > { %v4401_v30 = vmul.f32 %v4356_v44, %v859_v35  ;;  %1329 = vmatpush1.bf16.msra.mxu0 %v3283_v17 }
 0x1fb   : > { %v867_v15 = vpack.c.bf16 %v859_v35, %v858_v41  ;;  %v4404_v43 = vmul.f32 %v4356_v44, %v858_v41  ;;  %1330 = vmatprep.subr.bf16.mxu0 %v3288_v27 }
 0x1fd   : > { %2920 = vmatmul.mubr.bf16.gmra.mrb[28].mxu0 %v867_v15 }
 0x1fe   : > { %1331 = vmatpush1.bf16.msra.mxu0 %v3286_v56 }
 0x1ff   : > { %1332 = vmatprep.subr.bf16.mxu0 %v3291_v57 }
 0x202   : > { %1333 = vmatpush1.bf16.msra.mxu0 %v3289_v29 }
 0x203   : > { %1334 = vmatprep.subr.bf16.mxu0 %v3294_v61 }
 0x206   : > { %1335 = vmatpush1.bf16.msra.mxu0 %v3292_v63 }
 0x207   : > { %1336 = vmatprep.subr.bf16.mxu0 %v3297_v2 }
 0x20a   : > { %1337 = vmatpush1.bf16.msra.mxu0 %v3295_v4 }
 0x20b   : > { %1338 = vmatprep.subr.bf16.mxu0 %v3300_v5 }
 0x20e   : > { %1339 = vmatpush1.bf16.msra.mxu0 %v3298_v39 }
 0x2b8   : > { %v2909_v26 = vpop.f32.mrb[16].mxu0 }
 0x2b9   : > { %v979_v6 = vadd.f32 %v2909_v26, %v887_v8  ;;  %v970_v38 = vpop.f32.mrb[17].mxu0 }
 0x2ba   : > { %v971_v10 = vadd.f32 %v970_v38, %v887_v8  ;;  %v2910_v51 = vpop.f32.mrb[18].mxu0 }
 0x2bb   : > { %v982_v13 = vadd.f32 %v2910_v51, %v887_v8  ;;  %v973_v50 = vpop.f32.mrb[19].mxu0  ;;  %v1035_v16 = vmax.f32 %v979_v6, 0.0 }
 0x2bc   : > { %v974_v60 = vadd.f32 %v973_v50, %v887_v8  ;;  %v1033_v18 = vmax.f32 %v971_v10, 0.0 }
 0x2bd   : > { %v1036_v48 = vmax.f32 %v982_v13, 0.0 }
 0x2be   : > { %v1034_v9 = vmax.f32 %v974_v60, 0.0 }
 0x2bf   : > { %v1050_v42 = vpack.c.bf16 %v1036_v48, %v1035_v16 }
 0x2c0   : > { %v1049_v3 = vpack.c.bf16 %v1034_v9, %v1033_v18  ;;  %v2913_v22 = vpop.f32.mrb[20].mxu0 }
 0x2c1   : > { %v995_v54 = vadd.f32 %v2913_v22, %v887_v8  ;;  %v986_v36 = vpop.f32.mrb[21].mxu0  ;;  %v3777_v22 = vmov 0  }
 0x2c2   : > { %2939 = vmatprep.mubr.bf16.mxu1 %v1049_v3  ;;  %v987_v23 = vadd.f32 %v986_v36, %v887_v8  ;;  %v2914_v24 = vpop.f32.mrb[22].mxu0  ;;  %v3303_v3 = vld [vmem:[#allocation11 + $0x74] ss:$8 sps:$4 sm:$0xff]   ;;  %1358 = vmatprep.mubr.bf16.mxu0 %v3777_v22  ;;  %v4411_v36 = vld [vmem:[#allocation13 + $0x8] sm:$0xff]  }
 0x2c3   : > { %2940 = vmatmul.mubr.bf16.vlgmr.msra.gmra.mrb[16].mxu1 %v1050_v42  ;;  %v998_v28 = vadd.f32 %v2914_v24, %v887_v8  ;;  %v989_v52 = vpop.f32.mrb[23].mxu0  ;;  %v1039_v40 = vmax.f32 %v995_v54, 0.0  ;;  %v3301_v42 = vld [vmem:[#allocation11 + $0x70] ss:$8 sps:$4 sm:$0xff]   ;;  %1340 = vmatprep.subr.bf16.mxu0 %v3303_v3  ;;  %v4409_v54 = vld [vmem:[#allocation13] sm:$0xff]   ;;  %v1075_v24 = vsub.s32 3, %v4228_v25 }
 0x2c4   : > { %v990_v19 = vadd.f32 %v989_v52, %v887_v8  ;;  %v1037_v35 = vmax.f32 %v987_v23, 0.0  ;;  %1341 = vmatpush1.bf16.msra.mxu0 %v3301_v42  ;;  %2955 = vmatprep.subr.bf16.mxu1 %v4409_v54  ;;  %v4421_v23 = vld [vmem:[#allocation13 + $0x18] sm:$0xff]  }
 0x2c5   : > { %v1040_v12 = vmax.f32 %v998_v28, 0.0  ;;  %3019 = vmatprep.subr.bf16.mxu0 %v4409_v54  ;;  %2956 = vmatpush3.bf16.msra.mxu1 %v4409_v54  ;;  %v1076_v28 = vrot.slane %v4241_v55, %v1075_v24  ;;  %v4442_v24 = vld [vmem:[#allocation13 + $0x20] sm:$0xff]  }
 0x2c6   : > { %v1038_v41 = vmax.f32 %v990_v19, 0.0  ;;  %2957 = vmatprep.subr.bf16.mxu1 %v4411_v36 }
 0x2c7   : > { %v1052_v15 = vpack.c.bf16 %v1040_v12, %v1039_v40 }
 0x2c8   : > { %v1051_v47 = vpack.c.bf16 %v1038_v41, %v1037_v35  ;;  %v2917_v1 = vpop.f32.mrb[24].mxu0 }
 0x2c9   : > { %v1011_v21 = vadd.f32 %v2917_v1, %v887_v8  ;;  %v1002_v45 = vpop.f32.mrb[25].mxu0  ;;  %2958 = vmatpush3.bf16.msra.mxu1 %v4411_v36 }
 0x2ca   : > { %v1003_v53 = vadd.f32 %v1002_v45, %v887_v8  ;;  %v2918_v17 = vpop.f32.mrb[26].mxu0  ;;  %2943 = vmatprep.mubr.bf16.mxu1 %v1051_v47 }
 0x2cb   : > { %v1043_v27 = vmax.f32 %v1011_v21, 0.0  ;;  %v1014_v56 = vadd.f32 %v2918_v17, %v887_v8  ;;  %v1005_v57 = vpop.f32.mrb[27].mxu0  ;;  %2944 = vmatmul.mubr.bf16.gmra.mrb[20].mxu1 %v1052_v15 }
 0x2cc   : > { %v1041_v29 = vmax.f32 %v1003_v53, 0.0  ;;  %v1006_v61 = vadd.f32 %v1005_v57, %v887_v8 }
 0x2cd   : > { %v1044_v63 = vmax.f32 %v1014_v56, 0.0 }
 0x2ce   : > { %v1042_v2 = vmax.f32 %v1006_v61, 0.0 }
 0x2cf   : > { %v1054_v4 = vpack.c.bf16 %v1044_v63, %v1043_v27 }
 0x2d0   : > { %v1053_v5 = vpack.c.bf16 %v1042_v2, %v1041_v29  ;;  %v2921_v39 = vpop.f32.mrb[28].mxu0 }
 0x2d1   : > { %v1027_v7 = vadd.f32 %v2921_v39, %v887_v8  ;;  %v1018_v26 = vpop.f32.mrb[29].mxu0 }
 0x2d2   : > { %2947 = vmatprep.mubr.bf16.mxu1 %v1053_v5  ;;  %v1019_v6 = vadd.f32 %v1018_v26, %v887_v8  ;;  %v2922_v38 = vpop.f32.mrb[30].mxu0 }
 0x2d3   : > { %2948 = vmatmul.mubr.bf16.gmra.mrb[24].mxu1 %v1054_v4  ;;  %v1047_v10 = vmax.f32 %v1027_v7, 0.0  ;;  %v1030_v51 = vadd.f32 %v2922_v38, %v887_v8  ;;  %v1021_v13 = vpop.f32.mrb[31].mxu0 }
 0x2d4   : > { %v1045_v50 = vmax.f32 %v1019_v6, 0.0  ;;  %v1022_v60 = vadd.f32 %v1021_v13, %v887_v8  ;;  %v4417_v8 = vld [vmem:[#allocation13 + $0x10] sm:$0xff]  }
 0x2d5   : > { %v1048_v16 = vmax.f32 %v1030_v51, 0.0  ;;  %2959 = vmatprep.subr.bf16.mxu1 %v4417_v8 }
 0x2d6   : > { %v1046_v48 = vmax.f32 %v1022_v60, 0.0  ;;  %2960 = vmatpush3.bf16.msra.mxu1 %v4417_v8 }
 0x2d7   : > { %v1056_v18 = vpack.c.bf16 %v1048_v16, %v1047_v10  ;;  %2961 = vmatprep.subr.bf16.mxu1 %v4421_v23 }
 0x2d8   : > { %v1055_v9 = vpack.c.bf16 %v1046_v48, %v1045_v50 }
 0x2da   : > { %2951 = vmatprep.mubr.bf16.mxu1 %v1055_v9  ;;  %2962 = vmatpush3.bf16.msra.mxu1 %v4421_v23 }
 0x2db   : > { %2952 = vmatmul.mubr.bf16.gmra.mrb[28].mxu1 %v1056_v18  ;;  %2963 = vmatprep.subr.bf16.mxu1 %v4442_v24 }
 0x2de   : > { %2964 = vmatpush3.bf16.msra.mxu1 %v4442_v24 }
 0x396   : > { %v2941_v52 = vpop.f32.mrb[16].mxu1 }
 0x397   : > { %v1159_v19 = vpop.f32.mrb[17].mxu1  ;;  %v1168_v12 = vadd.f32 %v2941_v52, %v1076_v28  ;;  %v4460_v52 = vld [vmem:[#allocation13 + $0x38] sm:$0xff]  }
 0x398   : > { %v2942_v40 = vpop.f32.mrb[18].mxu1  ;;  %v1160_v15 = vadd.f32 %v1159_v19, %v1076_v28 }
 0x399   : > { %v1171_v35 = vadd.f32 %v2942_v40, %v1076_v28  ;;  %v1162_v41 = vpop.f32.mrb[19].mxu1 }
 0x39a   : > { %v1163_v47 = vadd.f32 %v1162_v41, %v1076_v28 }
 0x39b   : > { %v1223_v1 = vpack.c.bf16 %v1171_v35, %v1168_v12 }
 0x39c   : > { %v1222_v21 = vpack.c.bf16 %v1163_v47, %v1160_v15 }
 0x39e   : > { %1359 = vmatmul.mubr.bf16.vlgmr.msra.gmra.mrb[32].mxu0 %v1222_v21  ;;  %v2945_v45 = vpop.f32.mrb[20].mxu1 }
 0x39f   : > { %1368 = vmatprep.mubr.bf16.mxu0 %v3777_v22  ;;  %3020 = vmatpush3.bf16.msra.mxu0 %v4409_v54  ;;  %v1175_v53 = vpop.f32.mrb[21].mxu1  ;;  %v1184_v55 = vadd.f32 %v2945_v45, %v1076_v28 }
 0x3a0   : > { %3021 = vmatprep.subr.bf16.mxu0 %v4411_v36  ;;  %v2946_v25 = vpop.f32.mrb[22].mxu1  ;;  %v1176_v56 = vadd.f32 %v1175_v53, %v1076_v28 }
 0x3a1   : > { %v1187_v17 = vadd.f32 %v2946_v25, %v1076_v28  ;;  %v1178_v27 = vpop.f32.mrb[23].mxu1 }
 0x3a2   : > { %v1179_v57 = vadd.f32 %v1178_v27, %v1076_v28 }
 0x3a3   : > { %3022 = vmatpush3.bf16.msra.mxu0 %v4411_v36  ;;  %v1225_v29 = vpack.c.bf16 %v1187_v17, %v1184_v55 }
 0x3a4   : > { %3023 = vmatprep.subr.bf16.mxu0 %v4417_v8  ;;  %v1224_v61 = vpack.c.bf16 %v1179_v57, %v1176_v56 }
 0x3a6   : > { %1369 = vmatmul.mubr.bf16.gmra.mrb[36].mxu0 %v1223_v1  ;;  %v2949_v63 = vpop.f32.mrb[24].mxu1 }
 0x3a7   : > { %1378 = vmatprep.mubr.bf16.mxu0 %v3777_v22  ;;  %3024 = vmatpush3.bf16.msra.mxu0 %v4417_v8  ;;  %v1191_v2 = vpop.f32.mrb[25].mxu1  ;;  %v1200_v5 = vadd.f32 %v2949_v63, %v1076_v28 }
 0x3a8   : > { %3025 = vmatprep.subr.bf16.mxu0 %v4421_v23  ;;  %v2950_v4 = vpop.f32.mrb[26].mxu1  ;;  %v1192_v26 = vadd.f32 %v1191_v2, %v1076_v28 }
 0x3a9   : > { %v1203_v39 = vadd.f32 %v2950_v4, %v1076_v28  ;;  %v1194_v7 = vpop.f32.mrb[27].mxu1 }
 0x3aa   : > { %v1195_v6 = vadd.f32 %v1194_v7, %v1076_v28 }
 0x3ab   : > { %3026 = vmatpush3.bf16.msra.mxu0 %v4421_v23  ;;  %v1227_v38 = vpack.c.bf16 %v1203_v39, %v1200_v5 }
 0x3ac   : > { %v1226_v10 = vpack.c.bf16 %v1195_v6, %v1192_v26  ;;  %3027 = vmatprep.subr.bf16.mxu0 %v4442_v24 }
 0x3ae   : > { %1379 = vmatmul.mubr.bf16.gmra.mrb[40].mxu0 %v1224_v61  ;;  %v2953_v51 = vpop.f32.mrb[28].mxu1 }
 0x3af   : > { %1388 = vmatprep.mubr.bf16.mxu0 %v3777_v22  ;;  %v1216_v13 = vadd.f32 %v2953_v51, %v1076_v28  ;;  %v1207_v50 = vpop.f32.mrb[29].mxu1  ;;  %3028 = vmatpush3.bf16.msra.mxu0 %v4442_v24 }
 0x3b0   : > { %v1208_v60 = vadd.f32 %v1207_v50, %v1076_v28  ;;  %v2954_v16 = vpop.f32.mrb[30].mxu1 }
 0x3b1   : > { %v1219_v48 = vadd.f32 %v2954_v16, %v1076_v28  ;;  %v1210_v18 = vpop.f32.mrb[31].mxu1 }
 0x3b2   : > { %v1211_v9 = vadd.f32 %v1210_v18, %v1076_v28  ;;  %v4448_v28 = vld [vmem:[#allocation13 + $0x28] sm:$0xff]  }
 0x3b3   : > { %v1229_v42 = vpack.c.bf16 %v1219_v48, %v1216_v13  ;;  %2965 = vmatprep.subr.bf16.mxu1 %v4448_v28  ;;  %3029 = vmatprep.subr.bf16.mxu0 %v4448_v28 }
 0x3b4   : > { %v1228_v3 = vpack.c.bf16 %v1211_v9, %v1208_v60  ;;  %2966 = vmatpush3.bf16.msra.mxu1 %v4448_v28  ;;  %3030 = vmatpush3.bf16.msra.mxu0 %v4448_v28 }
 0x3b6   : > { %1389 = vmatmul.mubr.bf16.gmra.mrb[44].mxu0 %v1225_v29 }
 0x3b7   : > { %1398 = vmatprep.mubr.bf16.mxu0 %v3777_v22 }
 0x3be   : > { %1399 = vmatmul.mubr.bf16.gmra.mrb[48].mxu0 %v1226_v10 }
 0x3bf   : > { %1408 = vmatprep.mubr.bf16.mxu0 %v3777_v22 }
 0x3c6   : > { %1409 = vmatmul.mubr.bf16.gmra.mrb[52].mxu0 %v1227_v38 }
 0x3c7   : > { %1418 = vmatprep.mubr.bf16.mxu0 %v3777_v22 }
 0x3ce   : > { %1419 = vmatmul.mubr.bf16.gmra.mrb[56].mxu0 %v1228_v3 }
 0x3cf   : > { %1428 = vmatprep.mubr.bf16.mxu0 %v3777_v22  ;;  %v4454_v22 = vld [vmem:[#allocation13 + $0x30] sm:$0xff]  }
 0x3d0   : > { %2967 = vmatprep.subr.bf16.mxu1 %v4454_v22  ;;  %3031 = vmatprep.subr.bf16.mxu0 %v4454_v22 }
 0x3d1   : > { %2968 = vmatpush3.bf16.msra.mxu1 %v4454_v22  ;;  %3032 = vmatpush3.bf16.msra.mxu0 %v4454_v22 }
 0x3d2   : > { %2969 = vmatprep.subr.bf16.mxu1 %v4460_v52  ;;  %3033 = vmatprep.subr.bf16.mxu0 %v4460_v52 }
 0x3d5   : > { %2970 = vmatpush3.bf16.msra.mxu1 %v4460_v52  ;;  %3034 = vmatpush3.bf16.msra.mxu0 %v4460_v52 }
 0x3d6   : > { %1429 = vmatmul.mubr.bf16.gmra.mrb[60].mxu0 %v1229_v42  ;;  %2987 = vmatprep.subr.bf16.mxu1 %v4409_v54 }
 0x471   : > { %v1360_v19 = vpop.f32.mrb[32].mxu0 }
 0x472   : > { %1692 = vrot.lane.b32.xlu0 %v1360_v19, %s3778_s8  ;;  %v4468_v40 = vpop.f32.mrb[33].mxu0 }
 0x473   : > { %v1475_v12 = vmul.f32 %v4468_v40, %v1360_v19  ;;  %v1364_v35 = vpop.f32.mrb[34].mxu0 }
 0x474   : > { %1927 = vrot.lane.b32.xlu1 %v1364_v35, %s3779_s28  ;;  %v4472_v41 = vpop.f32.mrb[35].mxu0 }
 0x475   : > { %v1476_v15 = vmul.f32 %v4472_v41, %v1364_v35 }
 0x476   : > { %1925 = vrot.lane.b32.xlu0 %v1360_v19, %s3779_s28 }
 0x477   : > { %v1491_v47 = vpack.c.bf16 %v1476_v15, %v1475_v12 }
 0x478   : > { %2160 = vrot.lane.b32.xlu1 %v1364_v35, %s3780_s16 }
 0x479   : > { %v1370_v1 = vpop.f32.mrb[36].mxu0  ;;  %2971 = vmatprep.mubr.bf16.mxu1 %v1491_v47 }
 0x47a   : > { %2158 = vrot.lane.b32.xlu0 %v1360_v19, %s3780_s16  ;;  %v4478_v21 = vpop.f32.mrb[37].mxu0 }
 0x47b   : > { %v1477_v45 = vmul.f32 %v4478_v21, %v1370_v1  ;;  %v1374_v53 = vpop.f32.mrb[38].mxu0 }
 0x47c   : > { %1696 = vrot.lane.b32.xlu1 %v1370_v1, %s3778_s8  ;;  %v4482_v25 = vpop.f32.mrb[39].mxu0 }
 0x47d   : > { %v1478_v55 = vmul.f32 %v4482_v25, %v1374_v53 }
 0x47e   : > { %1694 = vrot.lane.b32.xlu0 %v1364_v35, %s3778_s8 }
 0x47f   : > { %v1492_v17 = vpack.c.bf16 %v1478_v55, %v1477_v45 }
 0x480   : > { %1698 = vrot.lane.b32.xlu1 %v1374_v53, %s3778_s8 }
 0x481   : > { %v1380_v27 = vpop.f32.mrb[40].mxu0  ;;  %2972 = vmatmul.mubr.bf16.vlgmr.msra.gmra.mrb[32].mxu1 %v1492_v17 }
 0x482   : > { %1929 = vrot.lane.b32.xlu0 %v1370_v1, %s3779_s28  ;;  %v4488_v56 = vpop.f32.mrb[41].mxu0  ;;  %2988 = vmatpush3.bf16.msra.mxu1 %v4409_v54 }
 0x483   : > { %v1479_v57 = vmul.f32 %v4488_v56, %v1380_v27  ;;  %v1384_v29 = vpop.f32.mrb[42].mxu0  ;;  %2989 = vmatprep.subr.bf16.mxu1 %v4411_v36 }
 0x484   : > { %1931 = vrot.lane.b32.xlu1 %v1374_v53, %s3779_s28  ;;  %v4494_v61 = vpop.f32.mrb[43].mxu0 }
 0x485   : > { %v1480_v63 = vmul.f32 %v4494_v61, %v1384_v29 }
 0x486   : > { %2162 = vrot.lane.b32.xlu0 %v1370_v1, %s3780_s16  ;;  %2990 = vmatpush3.bf16.msra.mxu1 %v4411_v36 }
 0x487   : > { %v1493_v2 = vpack.c.bf16 %v1480_v63, %v1479_v57  ;;  %2991 = vmatprep.subr.bf16.mxu1 %v4417_v8 }
 0x488   : > { %2164 = vrot.lane.b32.xlu1 %v1374_v53, %s3780_s16 }
 0x489   : > { %v1390_v4 = vpop.f32.mrb[44].mxu0  ;;  %2975 = vmatprep.mubr.bf16.mxu1 %v1493_v2 }
 0x48a   : > { %1700 = vrot.lane.b32.xlu0 %v1380_v27, %s3778_s8  ;;  %v4502_v5 = vpop.f32.mrb[45].mxu0  ;;  %2992 = vmatpush3.bf16.msra.mxu1 %v4417_v8 }
 0x48b   : > { %v1481_v39 = vmul.f32 %v4502_v5, %v1390_v4  ;;  %v1394_v7 = vpop.f32.mrb[46].mxu0  ;;  %2993 = vmatprep.subr.bf16.mxu1 %v4421_v23 }
 0x48c   : > { %1702 = vrot.lane.b32.xlu1 %v1384_v29, %s3778_s8  ;;  %v4508_v26 = vpop.f32.mrb[47].mxu0 }
 0x48d   : > { %v1482_v6 = vmul.f32 %v4508_v26, %v1394_v7 }
 0x48e   : > { %1933 = vrot.lane.b32.xlu0 %v1380_v27, %s3779_s28  ;;  %2994 = vmatpush3.bf16.msra.mxu1 %v4421_v23 }
 0x48f   : > { %v1494_v38 = vpack.c.bf16 %v1482_v6, %v1481_v39  ;;  %2995 = vmatprep.subr.bf16.mxu1 %v4442_v24 }
 0x490   : > { %1935 = vrot.lane.b32.xlu1 %v1384_v29, %s3779_s28 }
 0x491   : > { %v1400_v10 = vpop.f32.mrb[48].mxu0  ;;  %2976 = vmatmul.mubr.bf16.gmra.mrb[36].mxu1 %v1494_v38 }
 0x492   : > { %2166 = vrot.lane.b32.xlu0 %v1380_v27, %s3780_s16  ;;  %v4516_v51 = vpop.f32.mrb[49].mxu0  ;;  %2996 = vmatpush3.bf16.msra.mxu1 %v4442_v24 }
 0x493   : > { %v1483_v13 = vmul.f32 %v4516_v51, %v1400_v10  ;;  %v1404_v50 = vpop.f32.mrb[50].mxu0  ;;  %2997 = vmatprep.subr.bf16.mxu1 %v4448_v28 }
 0x494   : > { %2168 = vrot.lane.b32.xlu1 %v1384_v29, %s3780_s16  ;;  %v4522_v60 = vpop.f32.mrb[51].mxu0 }
 0x495   : > { %v1484_v16 = vmul.f32 %v4522_v60, %v1404_v50 }
 0x496   : > { %1704 = vrot.lane.b32.xlu0 %v1390_v4, %s3778_s8  ;;  %2998 = vmatpush3.bf16.msra.mxu1 %v4448_v28 }
 0x497   : > { %v1495_v48 = vpack.c.bf16 %v1484_v16, %v1483_v13  ;;  %2999 = vmatprep.subr.bf16.mxu1 %v4454_v22 }
 0x498   : > { %1706 = vrot.lane.b32.xlu1 %v1394_v7, %s3778_s8 }
 0x499   : > { %v1410_v18 = vpop.f32.mrb[52].mxu0  ;;  %2979 = vmatprep.mubr.bf16.mxu1 %v1495_v48 }
 0x49a   : > { %1937 = vrot.lane.b32.xlu0 %v1390_v4, %s3779_s28  ;;  %v4530_v9 = vpop.f32.mrb[53].mxu0  ;;  %3000 = vmatpush3.bf16.msra.mxu1 %v4454_v22 }
 0x49b   : > { %v1485_v42 = vmul.f32 %v4530_v9, %v1410_v18  ;;  %v1414_v3 = vpop.f32.mrb[54].mxu0  ;;  %3001 = vmatprep.subr.bf16.mxu1 %v4460_v52 }
 0x49c   : > { %1939 = vrot.lane.b32.xlu1 %v1394_v7, %s3779_s28  ;;  %v4536_v19 = vpop.f32.mrb[55].mxu0 }
 0x49d   : > { %v1486_v12 = vmul.f32 %v4536_v19, %v1414_v3 }
 0x49e   : > { %2170 = vrot.lane.b32.xlu0 %v1390_v4, %s3780_s16  ;;  %3002 = vmatpush3.bf16.msra.mxu1 %v4460_v52 }
 0x49f   : > { %v1496_v35 = vpack.c.bf16 %v1486_v12, %v1485_v42  ;;  %3051 = vmatprep.subr.bf16.mxu1 %v4409_v54 }
 0x4a0   : > { %2172 = vrot.lane.b32.xlu1 %v1394_v7, %s3780_s16 }
 0x4a1   : > { %v1420_v15 = vpop.f32.mrb[56].mxu0  ;;  %2980 = vmatmul.mubr.bf16.gmra.mrb[40].mxu1 %v1496_v35 }
 0x4a2   : > { %1708 = vrot.lane.b32.xlu0 %v1400_v10, %s3778_s8  ;;  %v4544_v47 = vpop.f32.mrb[57].mxu0 }
 0x4a3   : > { %v1487_v1 = vmul.f32 %v4544_v47, %v1420_v15  ;;  %v1424_v45 = vpop.f32.mrb[58].mxu0 }
 0x4a4   : > { %1710 = vrot.lane.b32.xlu1 %v1404_v50, %s3778_s8  ;;  %v4548_v53 = vpop.f32.mrb[59].mxu0 }
 0x4a5   : > { %v1488_v55 = vmul.f32 %v4548_v53, %v1424_v45 }
 0x4a6   : > { %1712 = vrot.lane.b32.xlu0 %v1410_v18, %s3778_s8 }
 0x4a7   : > { %v1497_v17 = vpack.c.bf16 %v1488_v55, %v1487_v1 }
 0x4a8   : > { %1714 = vrot.lane.b32.xlu1 %v1414_v3, %s3778_s8 }
 0x4a9   : > { %v1430_v27 = vpop.f32.mrb[60].mxu0  ;;  %2983 = vmatprep.mubr.bf16.mxu1 %v1497_v17 }
 0x4aa   : > { %1716 = vrot.lane.b32.xlu0 %v1420_v15, %s3778_s8  ;;  %v4554_v57 = vpop.f32.mrb[61].mxu0 }
 0x4ab   : > { %v1489_v29 = vmul.f32 %v4554_v57, %v1430_v27  ;;  %v1434_v63 = vpop.f32.mrb[62].mxu0 }
 0x4ac   : > { %1718 = vrot.lane.b32.xlu1 %v1424_v45, %s3778_s8  ;;  %v4558_v2 = vpop.f32.mrb[63].mxu0 }
 0x4ad   : > { %v1490_v4 = vmul.f32 %v4558_v2, %v1434_v63 }
 0x4ae   : > { %1720 = vrot.lane.b32.xlu0 %v1430_v27, %s3778_s8 }
 0x4af   : > { %v1498_v39 = vpack.c.bf16 %v1490_v4, %v1489_v29 }
 0x4b0   : > { %1722 = vrot.lane.b32.xlu1 %v1434_v63, %s3778_s8 }
 0x4b1   : > { %2984 = vmatmul.mubr.bf16.gmra.mrb[44].mxu1 %v1498_v39 }
 0x4b2   : > { %1941 = vrot.lane.b32.xlu0 %v1400_v10, %s3779_s28 }
 0x4b4   : > { %1943 = vrot.lane.b32.xlu1 %v1404_v50, %s3779_s28 }
 0x4b6   : > { %1945 = vrot.lane.b32.xlu0 %v1410_v18, %s3779_s28 }
 0x4b8   : > { %1947 = vrot.lane.b32.xlu1 %v1414_v3, %s3779_s28 }
 0x4ba   : > { %2174 = vrot.lane.b32.xlu0 %v1400_v10, %s3780_s16 }
 0x4bc   : > { %2176 = vrot.lane.b32.xlu1 %v1404_v50, %s3780_s16 }
 0x4be   : > { %2178 = vrot.lane.b32.xlu0 %v1410_v18, %s3780_s16 }
 0x4c0   : > { %2180 = vrot.lane.b32.xlu1 %v1414_v3, %s3780_s16 }
 0x4c2   : > { %1949 = vrot.lane.b32.xlu0 %v1420_v15, %s3779_s28 }
 0x4c4   : > { %1951 = vrot.lane.b32.xlu1 %v1424_v45, %s3779_s28 }
 0x4c6   : > { %1953 = vrot.lane.b32.xlu0 %v1430_v27, %s3779_s28 }
 0x4c8   : > { %2184 = vrot.lane.b32.xlu1 %v1424_v45, %s3780_s16 }
 0x4ca   : > { %2182 = vrot.lane.b32.xlu0 %v1420_v15, %s3780_s16 }
 0x4cc   : > { %1955 = vrot.lane.b32.xlu1 %v1434_v63, %s3779_s28 }
 0x4ce   : > { %2186 = vrot.lane.b32.xlu0 %v1430_v27, %s3780_s16 }
 0x4d0   : > { %2188 = vrot.lane.b32.xlu1 %v1434_v63, %s3780_s16 }
 0x4e4   : > { %v1693_v7 = vpop.permute.xlu0 %1692 }
 0x4e5   : > { %v1724_v15 = vmul.f32 %v1693_v7, %v4468_v40 }
 0x4e6   : > { %v1928_v6 = vpop.permute.xlu1 %1927 }
 0x4e7   : > { %v1958_v10 = vmul.f32 %v1928_v6, %v4472_v41 }
 0x4e8   : > { %v1926_v38 = vpop.permute.xlu0 %1925 }
 0x4e9   : > { %v1957_v13 = vmul.f32 %v1926_v38, %v4468_v40 }
 0x4ea   : > { %v2161_v50 = vpop.permute.xlu1 %2160 }
 0x4eb   : > { %v1973_v16 = vpack.c.bf16 %v1958_v10, %v1957_v13  ;;  %v4582_v18 = vmul.f32 %v2161_v50, %v4472_v41 }
 0x4ec   : > { %v2159_v48 = vpop.permute.xlu0 %2158 }
 0x4ed   : > { %v4585_v42 = vmul.f32 %v2159_v48, %v4468_v40  ;;  %3035 = vmatprep.mubr.bf16.mxu0 %v1973_v16 }
 0x4ee   : > { %v1697_v3 = vpop.permute.xlu1 %1696 }
 0x4ef   : > { %v2206_v12 = vpack.c.bf16 %v4582_v18, %v4585_v42  ;;  %v1726_v55 = vmul.f32 %v1697_v3, %v4478_v21 }
 0x4f0   : > { %v1695_v35 = vpop.permute.xlu0 %1694 }
 0x4f1   : > { %v1725_v1 = vmul.f32 %v1695_v35, %v4472_v41 }
 0x4f2   : > { %v1699_v45 = vpop.permute.xlu1 %1698 }
 0x4f3   : > { %v1740_v17 = vpack.c.bf16 %v1725_v1, %v1724_v15  ;;  %v1727_v27 = vmul.f32 %v1699_v45, %v4482_v25 }
 0x4f4   : > { %v1930_v29 = vpop.permute.xlu0 %1929 }
 0x4f5   : > { %v1741_v63 = vpack.c.bf16 %v1727_v27, %v1726_v55  ;;  %3003 = vmatprep.mubr.bf16.mxu1 %v1740_v17  ;;  %v1959_v39 = vmul.f32 %v1930_v29, %v4478_v21 }
 0x4f6   : > { %v1932_v4 = vpop.permute.xlu1 %1931 }
 0x4f7   : > { %v1960_v6 = vmul.f32 %v1932_v4, %v4482_v25  ;;  %3004 = vmatmul.mubr.bf16.vlgmr.msra.gmra.mrb[48].mxu1 %v1741_v63 }
 0x4f8   : > { %v2163_v38 = vpop.permute.xlu0 %2162  ;;  %3052 = vmatpush3.bf16.msra.mxu1 %v4409_v54 }
 0x4f9   : > { %v1974_v40 = vpack.c.bf16 %v1960_v6, %v1959_v39  ;;  %3053 = vmatprep.subr.bf16.mxu1 %v4411_v36  ;;  %v4598_v7 = vmul.f32 %v2163_v38, %v4478_v21 }
 0x4fa   : > { %v2165_v41 = vpop.permute.xlu1 %2164 }
 0x4fb   : > { %v4601_v10 = vmul.f32 %v2165_v41, %v4482_v25  ;;  %3036 = vmatmul.mubr.bf16.vlgmr.msra.gmra.mrb[64].mxu0 %v1974_v40 }
 0x4fc   : > { %v1701_v13 = vpop.permute.xlu0 %1700  ;;  %3054 = vmatpush3.bf16.msra.mxu1 %v4411_v36 }
 0x4fd   : > { %v2207_v50 = vpack.c.bf16 %v4601_v10, %v4598_v7  ;;  %3055 = vmatprep.subr.bf16.mxu1 %v4417_v8  ;;  %v1728_v16 = vmul.f32 %v1701_v13, %v4488_v56 }
 0x4fe   : > { %v1703_v54 = vpop.permute.xlu1 %1702 }
 0x4ff   : > { %v1729_v48 = vmul.f32 %v1703_v54, %v4494_v61 }
 0x500   : > { %v1934_v3 = vpop.permute.xlu0 %1933  ;;  %3056 = vmatpush3.bf16.msra.mxu1 %v4417_v8 }
 0x501   : > { %v1742_v21 = vpack.c.bf16 %v1729_v48, %v1728_v16  ;;  %3057 = vmatprep.subr.bf16.mxu1 %v4421_v23  ;;  %v1961_v35 = vmul.f32 %v1934_v3, %v4488_v56 }
 0x502   : > { %v1936_v25 = vpop.permute.xlu1 %1935 }
 0x503   : > { %v1962_v36 = vmul.f32 %v1936_v25, %v4494_v61  ;;  %3007 = vmatprep.mubr.bf16.mxu1 %v1742_v21 }
 0x504   : > { %v2167_v15 = vpop.permute.xlu0 %2166  ;;  %3058 = vmatpush3.bf16.msra.mxu1 %v4421_v23 }
 0x505   : > { %v1975_v1 = vpack.c.bf16 %v1962_v36, %v1961_v35  ;;  %3059 = vmatprep.subr.bf16.mxu1 %v4442_v24  ;;  %v4616_v55 = vmul.f32 %v2167_v15, %v4488_v56 }
 0x506   : > { %v2169_v45 = vpop.permute.xlu1 %2168 }
 0x507   : > { %v4619_v8 = vmul.f32 %v2169_v45, %v4494_v61  ;;  %3039 = vmatprep.mubr.bf16.mxu0 %v1975_v1 }
 0x508   : > { %v1705_v17 = vpop.permute.xlu0 %1704  ;;  %3060 = vmatpush3.bf16.msra.mxu1 %v4442_v24 }
 0x509   : > { %v2208_v27 = vpack.c.bf16 %v4619_v8, %v4616_v55  ;;  %3061 = vmatprep.subr.bf16.mxu1 %v4448_v28  ;;  %v1730_v29 = vmul.f32 %v1705_v17, %v4502_v5 }
 0x50a   : > { %v1707_v23 = vpop.permute.xlu1 %1706 }
 0x50b   : > { %v1731_v63 = vmul.f32 %v1707_v23, %v4508_v26 }
 0x50c   : > { %v1938_v4 = vpop.permute.xlu0 %1937  ;;  %3062 = vmatpush3.bf16.msra.mxu1 %v4448_v28 }
 0x50d   : > { %v1743_v56 = vpack.c.bf16 %v1731_v63, %v1730_v29  ;;  %3063 = vmatprep.subr.bf16.mxu1 %v4454_v22  ;;  %v1963_v39 = vmul.f32 %v1938_v4, %v4502_v5 }
 0x50e   : > { %v1940_v61 = vpop.permute.xlu1 %1939 }
 0x50f   : > { %v1964_v24 = vmul.f32 %v1940_v61, %v4508_v26  ;;  %3008 = vmatmul.mubr.bf16.gmra.mrb[52].mxu1 %v1743_v56 }
 0x510   : > { %v2171_v6 = vpop.permute.xlu0 %2170  ;;  %3064 = vmatpush3.bf16.msra.mxu1 %v4454_v22 }
 0x511   : > { %v1976_v38 = vpack.c.bf16 %v1964_v24, %v1963_v39  ;;  %3065 = vmatprep.subr.bf16.mxu1 %v4460_v52  ;;  %v2196_v41 = vmul.f32 %v2171_v6, %v4502_v5 }
 0x512   : > { %v2173_v40 = vpop.permute.xlu1 %2172 }
 0x513   : > { %v2197_v28 = vmul.f32 %v2173_v40, %v4508_v26  ;;  %3040 = vmatmul.mubr.bf16.gmra.mrb[68].mxu0 %v1976_v38 }
 0x514   : > { %v1709_v13 = vpop.permute.xlu0 %1708  ;;  %3066 = vmatpush3.bf16.msra.mxu1 %v4460_v52 }
 0x515   : > { %v2209_v54 = vpack.c.bf16 %v2197_v28, %v2196_v41  ;;  %v1732_v48 = vmul.f32 %v1709_v13, %v4516_v51 }
 0x516   : > { %v1711_v16 = vpop.permute.xlu1 %1710 }
 0x517   : > { %v1733_v3 = vmul.f32 %v1711_v16, %v4522_v60 }
 0x518   : > { %v1713_v21 = vpop.permute.xlu0 %1712 }
 0x519   : > { %v1744_v22 = vpack.c.bf16 %v1733_v3, %v1732_v48  ;;  %v1734_v35 = vmul.f32 %v1713_v21, %v4530_v9 }
 0x51a   : > { %v1715_v25 = vpop.permute.xlu1 %1714 }
 0x51b   : > { %v1735_v36 = vmul.f32 %v1715_v25, %v4536_v19  ;;  %3011 = vmatprep.mubr.bf16.mxu1 %v1744_v22 }
 0x51c   : > { %v1717_v5 = vpop.permute.xlu0 %1716 }
 0x51d   : > { %v1745_v26 = vpack.c.bf16 %v1735_v36, %v1734_v35  ;;  %v1736_v1 = vmul.f32 %v1717_v5, %v4544_v47 }
 0x51e   : > { %v1719_v15 = vpop.permute.xlu1 %1718 }
 0x51f   : > { %v1737_v52 = vmul.f32 %v1719_v15, %v4548_v53  ;;  %3012 = vmatmul.mubr.bf16.gmra.mrb[56].mxu1 %v1745_v26 }
 0x520   : > { %v1721_v45 = vpop.permute.xlu0 %1720 }
 0x521   : > { %v1746_v17 = vpack.c.bf16 %v1737_v52, %v1736_v1  ;;  %v1738_v29 = vmul.f32 %v1721_v45, %v4554_v57 }
 0x522   : > { %v1723_v23 = vpop.permute.xlu1 %1722 }
 0x523   : > { %v1739_v63 = vmul.f32 %v1723_v23, %v4558_v2  ;;  %3015 = vmatprep.mubr.bf16.mxu1 %v1746_v17 }
 0x524   : > { %v1942_v4 = vpop.permute.xlu0 %1941 }
 0x525   : > { %v1747_v56 = vpack.c.bf16 %v1739_v63, %v1738_v29  ;;  %v1965_v39 = vmul.f32 %v1942_v4, %v4516_v51 }
 0x526   : > { %v1944_v61 = vpop.permute.xlu1 %1943 }
 0x527   : > { %v1966_v24 = vmul.f32 %v1944_v61, %v4522_v60  ;;  %3016 = vmatmul.mubr.bf16.gmra.mrb[60].mxu1 %v1747_v56 }
 0x528   : > { %v1946_v6 = vpop.permute.xlu0 %1945  ;;  %3067 = vmatprep.mubr.bf16.mxu1 %v2206_v12 }
 0x529   : > { %v1977_v38 = vpack.c.bf16 %v1966_v24, %v1965_v39  ;;  %v1967_v41 = vmul.f32 %v1946_v6, %v4530_v9 }
 0x52a   : > { %v1948_v40 = vpop.permute.xlu1 %1947 }
 0x52b   : > { %v1968_v28 = vmul.f32 %v1948_v40, %v4536_v19  ;;  %3043 = vmatprep.mubr.bf16.mxu0 %v1977_v38 }
 0x52c   : > { %v2175_v13 = vpop.permute.xlu0 %2174 }
 0x52d   : > { %v1978_v16 = vpack.c.bf16 %v1968_v28, %v1967_v41  ;;  %v2198_v3 = vmul.f32 %v2175_v13, %v4516_v51 }
 0x52e   : > { %v2177_v48 = vpop.permute.xlu1 %2176 }
 0x52f   : > { %v2199_v21 = vmul.f32 %v2177_v48, %v4522_v60  ;;  %3044 = vmatmul.mubr.bf16.gmra.mrb[72].mxu0 %v1978_v16  ;;  %3068 = vmatmul.mubr.bf16.vlgmr.msra.gmra.mrb[64].mxu1 %v2207_v50 }
 0x530   : > { %v2179_v18 = vpop.permute.xlu0 %2178  ;;  %3071 = vmatprep.mubr.bf16.mxu1 %v2208_v27 }
 0x531   : > { %v2210_v42 = vpack.c.bf16 %v2199_v21, %v2198_v3  ;;  %v2200_v22 = vmul.f32 %v2179_v18, %v4530_v9 }
 0x532   : > { %v2181_v12 = vpop.permute.xlu1 %2180 }
 0x533   : > { %v2201_v25 = vmul.f32 %v2181_v12, %v4536_v19 }
 0x534   : > { %v1950_v35 = vpop.permute.xlu0 %1949 }
 0x535   : > { %v2211_v51 = vpack.c.bf16 %v2201_v25, %v2200_v22  ;;  %v1969_v60 = vmul.f32 %v1950_v35, %v4544_v47  ;;  %v4703_v22 = vmul.f32 %v4356_v44, %v4308_v32 }
 0x536   : > { %v1952_v36 = vpop.permute.xlu1 %1951 }
 0x537   : > { %v1970_v5 = vmul.f32 %v1952_v36, %v4548_v53  ;;  %3072 = vmatmul.mubr.bf16.gmra.mrb[68].mxu1 %v2209_v54 }
 0x538   : > { %v1954_v7 = vpop.permute.xlu0 %1953  ;;  %3075 = vmatprep.mubr.bf16.mxu1 %v2210_v42 }
 0x539   : > { %v1979_v10 = vpack.c.bf16 %v1970_v5, %v1969_v60  ;;  %v1971_v19 = vmul.f32 %v1954_v7, %v4554_v57 }
 0x53a   : > { %v2185_v50 = vpop.permute.xlu1 %2184 }
 0x53b   : > { %3047 = vmatprep.mubr.bf16.mxu0 %v1979_v10  ;;  %v2203_v8 = vmul.f32 %v2185_v50, %v4548_v53  ;;  %v4716_v50 = vmul.f32 %v4356_v44, %v4286_v20 }
 0x53c   : > { %v2183_v55 = vpop.permute.xlu0 %2182 }
 0x53d   : > { %v2202_v9 = vmul.f32 %v2183_v55, %v4544_v47 }
 0x53e   : > { %v1956_v27 = vpop.permute.xlu1 %1955 }
 0x53f   : > { %v2212_v26 = vpack.c.bf16 %v2203_v8, %v2202_v9  ;;  %v1972_v15 = vmul.f32 %v1956_v27, %v4558_v2  ;;  %3076 = vmatmul.mubr.bf16.gmra.mrb[72].mxu1 %v2211_v51  ;;  %v4708_v51 = vmul.f32 %v4356_v44, %v4311_v37  ;;  %v4722_v8 = vmul.f32 %v4356_v44, %v4290_v59 }
 0x540   : > { %v2187_v1 = vpop.permute.xlu0 %2186 }
 0x541   : > { %v1980_v52 = vpack.c.bf16 %v1972_v15, %v1971_v19  ;;  %3079 = vmatprep.mubr.bf16.mxu1 %v2212_v26  ;;  %v2204_v45 = vmul.f32 %v2187_v1, %v4554_v57 }
 0x542   : > { %v2189_v54 = vpop.permute.xlu1 %2188 }
 0x543   : > { %v2205_v17 = vmul.f32 %v2189_v54, %v4558_v2  ;;  %3048 = vmatmul.mubr.bf16.gmra.mrb[76].mxu0 %v1980_v52 }
 0x545   : > { %v2213_v23 = vpack.c.bf16 %v2205_v17, %v2204_v45 }
 0x547   : > { %3080 = vmatmul.mubr.bf16.gmra.mrb[76].mxu1 %v2213_v23 }
 0x554   : > { %v4669_v53 = vpop.f32.mrb[32].mxu1 }
 0x555   : > { %v4671_v47 = vpop.f32.mrb[33].mxu1 }
 0x556   : > { %v4673_v29 = vpop.f32.mrb[34].mxu1 }
 0x557   : > { %v4675_v63 = vpop.f32.mrb[35].mxu1 }
 0x564   : > { %v4677_v4 = vpop.f32.mrb[36].mxu1 }
 0x565   : > { %v4679_v56 = vpop.f32.mrb[37].mxu1 }
 0x566   : > { %v4681_v61 = vpop.f32.mrb[38].mxu1 }
 0x567   : > { %v4683_v57 = vpop.f32.mrb[39].mxu1 }
 0x574   : > { %v4685_v2 = vpop.f32.mrb[40].mxu1 }
 0x575   : > { %v4687_v39 = vpop.f32.mrb[41].mxu1 }
 0x576   : > { %v4689_v24 = vpop.f32.mrb[42].mxu1 }
 0x577   : > { %v4691_v6 = vpop.f32.mrb[43].mxu1 }
 0x584   : > { %v4693_v38 = vpop.f32.mrb[44].mxu1 }
 0x585   : > { %v4695_v40 = vpop.f32.mrb[45].mxu1 }
 0x586   : > { %v4697_v41 = vpop.f32.mrb[46].mxu1 }
 0x587   : > { %v4699_v28 = vpop.f32.mrb[47].mxu1 }
 0x5ca   : > { %v3005_v13 = vpop.f32.mrb[48].mxu1 }
 0x5cb   : > { %3344 = vtanh.f32 %v3005_v13  ;;  %v1782_v16 = vpop.f32.mrb[49].mxu1 }
 0x5cc   : > { %v3006_v48 = vpop.f32.mrb[50].mxu1 }
 0x5cd   : > { %3346 = vtanh.f32 %v3006_v48  ;;  %v1785_v3 = vpop.f32.mrb[51].mxu1 }
 0x5ce   : > { %v3037_v21 = vpop.f32.mrb[64].mxu0 }
 0x5cf   : > { %3348 = vtanh.f32 %v3037_v21  ;;  %v2015_v18 = vpop.f32.mrb[65].mxu0 }
 0x5d0   : > { %3350 = vtanh.f32 %v1782_v16  ;;  %v3038_v42 = vpop.f32.mrb[66].mxu0  ;;  %v4735_v16 = vmul.f32 %v4356_v44, %v4344_v34 }
 0x5d1   : > { %3352 = vtanh.f32 %v3038_v42  ;;  %v2018_v12 = vpop.f32.mrb[67].mxu0 }
 0x5d2   : > { %3354 = vtanh.f32 %v1785_v3  ;;  %v4739_v3 = vmul.f32 %v4356_v44, %v4349_v62  ;;  %v4748_v62 = vmul.f32 %v4356_v44, %v4334_v46 }
 0x5d3   : > { %3356 = vtanh.f32 %v2015_v18 }
 0x5d4   : > { %3358 = vtanh.f32 %v2018_v12 }
 0x5d5   : > { %v3345_v25 = vpop.eup %3344 }
 0x5d6   : > { %v1863_v35 = vmul.f32 %v3345_v25, %v4703_v22 }
 0x5d7   : > { %v3347_v36 = vpop.eup %3346 }
 0x5d8   : > { %1881 = vrot.lane.b32.xlu0 %v1863_v35, %s3780_s16  ;;  %v1864_v60 = vmul.f32 %v3347_v36, %v4708_v51 }
 0x5d9   : > { %v3349_v5 = vpop.eup %3348 }
 0x5da   : > { %v3351_v7 = vpop.eup %3350  ;;  %1883 = vrot.lane.b32.xlu1 %v1864_v60, %s3780_s16  ;;  %v2096_v32 = vmul.f32 %v3349_v5, %v4703_v22 }
 0x5db   : > { %v3353_v10 = vpop.eup %3352  ;;  %v1861_v9 = vmul.f32 %v3351_v7, %v4716_v50 }
 0x5dc   : > { %2114 = vrot.lane.b32.xlu0 %v2096_v32, %s3779_s28  ;;  %v2097_v37 = vmul.f32 %v3353_v10, %v4708_v51  ;;  %v3355_v55 = vpop.eup %3354 }
 0x5dd   : > { %v3357_v27 = vpop.eup %3356  ;;  %v1862_v19 = vmul.f32 %v3355_v55, %v4722_v8 }
 0x5de   : > { %2116 = vrot.lane.b32.xlu1 %v2097_v37, %s3779_s28  ;;  %v3359_v20 = vpop.eup %3358  ;;  %v2094_v15 = vmul.f32 %v3357_v27, %v4716_v50  ;;  %v4754_v37 = vmul.f32 %v4356_v44, %v4338_v49  ;;  %v4764_v49 = vmul.f32 %v4356_v44, %v4382_v0 }
 0x5df   : > { %v2095_v52 = vmul.f32 %v3359_v20, %v4722_v8 }
 0x5e0   : > { %1877 = vrot.lane.b32.xlu0 %v1861_v9, %s3780_s16 }
 0x5e2   : > { %1879 = vrot.lane.b32.xlu1 %v1862_v19, %s3780_s16  ;;  %v3009_v26 = vpop.f32.mrb[52].mxu1 }
 0x5e3   : > { %3360 = vtanh.f32 %v3009_v26  ;;  %v1798_v1 = vpop.f32.mrb[53].mxu1 }
 0x5e4   : > { %2110 = vrot.lane.b32.xlu0 %v2094_v15, %s3779_s28  ;;  %v3010_v59 = vpop.f32.mrb[54].mxu1 }
 0x5e5   : > { %3362 = vtanh.f32 %v3010_v59  ;;  %v1801_v54 = vpop.f32.mrb[55].mxu1 }
 0x5e6   : > { %v3041_v45 = vpop.f32.mrb[68].mxu0  ;;  %2112 = vrot.lane.b32.xlu1 %v2095_v52, %s3779_s28 }
 0x5e7   : > { %3364 = vtanh.f32 %v3041_v45  ;;  %v2031_v17 = vpop.f32.mrb[69].mxu0 }
 0x5e8   : > { %3366 = vtanh.f32 %v1798_v1  ;;  %v3042_v23 = vpop.f32.mrb[70].mxu0 }
 0x5e9   : > { %3368 = vtanh.f32 %v3042_v23  ;;  %v2034_v13 = vpop.f32.mrb[71].mxu0 }
 0x5ea   : > { %3370 = vtanh.f32 %v1801_v54  ;;  %v4770_v54 = vmul.f32 %v4356_v44, %v4377_v14 }
 0x5eb   : > { %3372 = vtanh.f32 %v2031_v17 }
 0x5ec   : > { %3374 = vtanh.f32 %v2034_v13 }
 0x5ed   : > { %v3361_v48 = vpop.eup %3360 }
 0x5ee   : > { %v1867_v21 = vmul.f32 %v3361_v48, %v4735_v16 }
 0x5ef   : > { %v3363_v18 = vpop.eup %3362 }
 0x5f0   : > { %1889 = vrot.lane.b32.xlu0 %v1867_v21, %s3780_s16  ;;  %v1868_v42 = vmul.f32 %v3363_v18, %v4739_v3 }
 0x5f1   : > { %v3365_v12 = vpop.eup %3364 }
 0x5f2   : > { %v3367_v25 = vpop.eup %3366  ;;  %1891 = vrot.lane.b32.xlu1 %v1868_v42, %s3780_s16  ;;  %v3013_v34 = vpop.f32.mrb[56].mxu1  ;;  %v2100_v35 = vmul.f32 %v3365_v12, %v4735_v16 }
 0x5f3   : > { %v3369_v36 = vpop.eup %3368  ;;  %3376 = vtanh.f32 %v3013_v34  ;;  %v1814_v60 = vpop.f32.mrb[57].mxu1  ;;  %v1865_v55 = vmul.f32 %v3367_v25, %v4748_v62 }
 0x5f4   : > { %2122 = vrot.lane.b32.xlu0 %v2100_v35, %s3779_s28  ;;  %v3014_v5 = vpop.f32.mrb[58].mxu1  ;;  %v2101_v7 = vmul.f32 %v3369_v36, %v4739_v3  ;;  %v3371_v32 = vpop.eup %3370 }
 0x5f5   : > { %3378 = vtanh.f32 %v3014_v5  ;;  %v1817_v10 = vpop.f32.mrb[59].mxu1  ;;  %v3373_v9 = vpop.eup %3372  ;;  %v1866_v46 = vmul.f32 %v3371_v32, %v4754_v37  ;;  %v4792_v32 = vmul.f32 %v4356_v44, %v4363_v11 }
 0x5f6   : > { %2124 = vrot.lane.b32.xlu1 %v2101_v7, %s3779_s28  ;;  %v3375_v27 = vpop.eup %3374  ;;  %v2098_v20 = vmul.f32 %v3373_v9, %v4748_v62 }
 0x5f7   : > { %v2099_v1 = vmul.f32 %v3375_v27, %v4754_v37 }
 0x5f8   : > { %1885 = vrot.lane.b32.xlu0 %v1865_v55, %s3780_s16 }
 0x5fa   : > { %1887 = vrot.lane.b32.xlu1 %v1866_v46, %s3780_s16  ;;  %v3017_v19 = vpop.f32.mrb[60].mxu1 }
 0x5fb   : > { %v1830_v26 = vpop.f32.mrb[61].mxu1 }
 0x5fc   : > { %2118 = vrot.lane.b32.xlu0 %v2098_v20, %s3779_s28  ;;  %v3018_v15 = vpop.f32.mrb[62].mxu1 }
 0x5fd   : > { %v3377_v59 = vpop.eup %3376  ;;  %v1833_v52 = vpop.f32.mrb[63].mxu1 }
 0x5fe   : > { %2120 = vrot.lane.b32.xlu1 %v2099_v1, %s3779_s28  ;;  %v1871_v45 = vmul.f32 %v3377_v59, %v4764_v49 }
 0x5ff   : > { %v3379_v17 = vpop.eup %3378 }
 0x600   : > { %1897 = vrot.lane.b32.xlu0 %v1871_v45, %s3780_s16  ;;  %v1872_v0 = vmul.f32 %v3379_v17, %v4770_v54 }
 0x602   : > { %v3045_v23 = vpop.f32.mrb[72].mxu0  ;;  %1899 = vrot.lane.b32.xlu1 %v1872_v0, %s3780_s16  ;;  %v3069_v13 = vpop.f32.mrb[64].mxu1 }
 0x603   : > { %3380 = vtanh.f32 %v3045_v23  ;;  %v2047_v48 = vpop.f32.mrb[73].mxu0  ;;  %v4777_v21 = vpop.f32.mrb[65].mxu1 }
 0x604   : > { %v3046_v18 = vpop.f32.mrb[74].mxu0  ;;  %v3070_v14 = vpop.f32.mrb[66].mxu1  ;;  %3382 = vtanh.f32 %v1814_v60 }
 0x605   : > { %v2050_v42 = vpop.f32.mrb[75].mxu0  ;;  %v4779_v12 = vpop.f32.mrb[67].mxu1  ;;  %3384 = vtanh.f32 %v3046_v18 }
 0x606   : > { %3386 = vtanh.f32 %v1817_v10 }
 0x607   : > { %3388 = vtanh.f32 %v2047_v48 }
 0x608   : > { %3390 = vtanh.f32 %v3017_v19 }
 0x609   : > { %3392 = vtanh.f32 %v2050_v42 }
 0x60a   : > { %v4781_v25 = vpop.f32.mrb[68].mxu1  ;;  %3394 = vtanh.f32 %v3018_v15 }
 0x60b   : > { %v4783_v34 = vpop.f32.mrb[69].mxu1 }
 0x60c   : > { %v4785_v35 = vpop.f32.mrb[70].mxu1 }
 0x60d   : > { %v3381_v36 = vpop.eup %3380  ;;  %v4787_v5 = vpop.f32.mrb[71].mxu1 }
 0x60e   : > { %v2104_v7 = vmul.f32 %v3381_v36, %v4764_v49  ;;  %v3383_v60 = vpop.eup %3382 }
 0x60f   : > { %v3385_v10 = vpop.eup %3384  ;;  %v1869_v27 = vmul.f32 %v3383_v60, %v4792_v32 }
 0x610   : > { %2130 = vrot.lane.b32.xlu0 %v2104_v7, %s3779_s28  ;;  %v3387_v55 = vpop.eup %3386  ;;  %v2105_v9 = vmul.f32 %v3385_v10, %v4770_v54 }
 0x611   : > { %v3389_v19 = vpop.eup %3388  ;;  %v1870_v59 = vmul.f32 %v3387_v55, %v4371_v58 }
 0x612   : > { %v4796_v46 = vpop.f32.mrb[72].mxu1  ;;  %2132 = vrot.lane.b32.xlu1 %v2105_v9, %s3779_s28  ;;  %v3391_v1 = vpop.eup %3390  ;;  %v2102_v45 = vmul.f32 %v3389_v19, %v4792_v32 }
 0x613   : > { %v4799_v20 = vpop.f32.mrb[73].mxu1  ;;  %v3393_v17 = vpop.eup %3392  ;;  %v1875_v36 = vmul.f32 %v3391_v1, %v4404_v43 }
 0x614   : > { %1893 = vrot.lane.b32.xlu0 %v1869_v27, %s3780_s16  ;;  %v4803_v44 = vpop.f32.mrb[74].mxu1  ;;  %v2103_v18 = vmul.f32 %v3393_v17, %v4371_v58  ;;  %v3395_v7 = vpop.eup %3394 }
 0x615   : > { %v4805_v11 = vpop.f32.mrb[75].mxu1  ;;  %v1876_v55 = vmul.f32 %v3395_v7, %v4401_v30 }
 0x616   : > { %v3049_v15 = vpop.f32.mrb[76].mxu0  ;;  %1895 = vrot.lane.b32.xlu1 %v1870_v59, %s3780_s16 }
 0x617   : > { %3396 = vtanh.f32 %v3049_v15  ;;  %v2063_v0 = vpop.f32.mrb[77].mxu0 }
 0x618   : > { %3398 = vtanh.f32 %v1830_v26  ;;  %v3050_v23 = vpop.f32.mrb[78].mxu0  ;;  %2126 = vrot.lane.b32.xlu0 %v2102_v45, %s3779_s28 }
 0x619   : > { %3400 = vtanh.f32 %v3050_v23  ;;  %v2066_v48 = vpop.f32.mrb[79].mxu0 }
 0x61a   : > { %v4812_v42 = vpop.f32.mrb[76].mxu1  ;;  %3402 = vtanh.f32 %v1833_v52  ;;  %2128 = vrot.lane.b32.xlu1 %v2103_v18, %s3779_s28 }
 0x61b   : > { %v2296_v60 = vpop.f32.mrb[77].mxu1  ;;  %3404 = vtanh.f32 %v2063_v0 }
 0x61c   : > { %1905 = vrot.lane.b32.xlu0 %v1875_v36, %s3780_s16  ;;  %v4817_v26 = vpop.f32.mrb[78].mxu1  ;;  %3406 = vtanh.f32 %v2066_v48 }
 0x61d   : > { %v2299_v10 = vpop.f32.mrb[79].mxu1  ;;  %3408 = vtanh.f32 %v3069_v13 }
 0x61e   : > { %1907 = vrot.lane.b32.xlu1 %v1876_v55, %s3780_s16  ;;  %3410 = vtanh.f32 %v3070_v14 }
 0x61f   : > { %3412 = vtanh.f32 %v4777_v21 }
 0x620   : > { %3414 = vtanh.f32 %v4779_v12 }
 0x621   : > { %v3397_v9 = vpop.eup %3396  ;;  %3416 = vtanh.f32 %v4781_v25 }
 0x622   : > { %v3399_v27 = vpop.eup %3398  ;;  %v2108_v19 = vmul.f32 %v3397_v9, %v4404_v43  ;;  %3418 = vtanh.f32 %v4785_v35 }
 0x623   : > { %v3401_v52 = vpop.eup %3400  ;;  %v1873_v59 = vmul.f32 %v3399_v27, %v4396_v33  ;;  %3420 = vtanh.f32 %v4783_v34 }
 0x624   : > { %2138 = vrot.lane.b32.xlu0 %v2108_v19, %s3779_s28  ;;  %v2109_v1 = vmul.f32 %v3401_v52, %v4401_v30  ;;  %v3403_v15 = vpop.eup %3402  ;;  %3422 = vtanh.f32 %v4787_v5 }
 0x625   : > { %v3405_v45 = vpop.eup %3404  ;;  %v1874_v13 = vmul.f32 %v3403_v15, %v4392_v31  ;;  %3424 = vtanh.f32 %v4796_v46 }
 0x626   : > { %2140 = vrot.lane.b32.xlu1 %v2109_v1, %s3779_s28  ;;  %v3407_v17 = vpop.eup %3406  ;;  %v2106_v14 = vmul.f32 %v3405_v45, %v4396_v33  ;;  %3426 = vtanh.f32 %v4803_v44 }
 0x627   : > { %v3409_v0 = vpop.eup %3408  ;;  %v2107_v21 = vmul.f32 %v3407_v17, %v4392_v31  ;;  %3428 = vtanh.f32 %v4799_v20 }
 0x628   : > { %1901 = vrot.lane.b32.xlu0 %v1873_v59, %s3780_s16  ;;  %v3411_v23 = vpop.eup %3410  ;;  %v2329_v12 = vmul.f32 %v3409_v0, %v4703_v22  ;;  %3430 = vtanh.f32 %v4805_v11 }
 0x629   : > { %v3413_v48 = vpop.eup %3412  ;;  %v2330_v25 = vmul.f32 %v3411_v23, %v4708_v51  ;;  %3432 = vtanh.f32 %v2296_v60 }
 0x62a   : > { %1903 = vrot.lane.b32.xlu1 %v1874_v13, %s3780_s16  ;;  %v3415_v18 = vpop.eup %3414  ;;  %v2327_v35 = vmul.f32 %v3413_v48, %v4716_v50  ;;  %3434 = vtanh.f32 %v2299_v10 }
 0x62b   : > { %v3417_v36 = vpop.eup %3416  ;;  %v2328_v34 = vmul.f32 %v3415_v18, %v4722_v8  ;;  %3436 = vtanh.f32 %v4812_v42 }
 0x62c   : > { %2134 = vrot.lane.b32.xlu0 %v2106_v14, %s3779_s28  ;;  %v3419_v7 = vpop.eup %3418  ;;  %v2333_v5 = vmul.f32 %v3417_v36, %v4735_v16  ;;  %3438 = vtanh.f32 %v4817_v26 }
 0x62d   : > { %v3421_v55 = vpop.eup %3420  ;;  %v2334_v46 = vmul.f32 %v3419_v7, %v4739_v3  ;;  %3440 = vtanh.f32 %v4669_v53 }
 0x62e   : > { %2136 = vrot.lane.b32.xlu1 %v2107_v21, %s3779_s28  ;;  %v3423_v9 = vpop.eup %3422  ;;  %v2331_v44 = vmul.f32 %v3421_v55, %v4748_v62  ;;  %3442 = vtanh.f32 %v4673_v29 }
 0x62f   : > { %v3425_v27 = vpop.eup %3424  ;;  %v2332_v20 = vmul.f32 %v3423_v9, %v4754_v37  ;;  %3444 = vtanh.f32 %v4671_v47 }
 0x630   : > { %2347 = vrot.lane.b32.xlu0 %v2329_v12, %s3778_s8  ;;  %v3427_v19 = vpop.eup %3426  ;;  %v2337_v11 = vmul.f32 %v3425_v27, %v4764_v49  ;;  %3446 = vtanh.f32 %v4675_v63 }
 0x631   : > { %v3429_v52 = vpop.eup %3428  ;;  %v2338_v60 = vmul.f32 %v3427_v19, %v4770_v54  ;;  %3448 = vtanh.f32 %v4677_v4 }
 0x632   : > { %2349 = vrot.lane.b32.xlu1 %v2330_v25, %s3778_s8  ;;  %v3431_v1 = vpop.eup %3430  ;;  %v2335_v10 = vmul.f32 %v3429_v52, %v4792_v32  ;;  %3450 = vtanh.f32 %v4681_v61 }
 0x633   : > { %v3433_v15 = vpop.eup %3432  ;;  %v2336_v42 = vmul.f32 %v3431_v1, %v4371_v58  ;;  %3452 = vtanh.f32 %v4679_v56 }
 0x634   : > { %2343 = vrot.lane.b32.xlu0 %v2327_v35, %s3778_s8  ;;  %v3435_v59 = vpop.eup %3434  ;;  %v2339_v45 = vmul.f32 %v3433_v15, %v4396_v33  ;;  %3454 = vtanh.f32 %v4683_v57 }
 0x635   : > { %v3437_v26 = vpop.eup %3436  ;;  %v2340_v13 = vmul.f32 %v3435_v59, %v4392_v31  ;;  %3456 = vtanh.f32 %v4685_v2  ;;  %v3473_v2 = vld [vmem:[%s4098_s14 + $0x18] sm:$0xff] }
 0x636   : > { %2345 = vrot.lane.b32.xlu1 %v2328_v34, %s3778_s8  ;;  %v3439_v17 = vpop.eup %3438  ;;  %v2341_v14 = vmul.f32 %v3437_v26, %v4404_v43  ;;  %3458 = vtanh.f32 %v4689_v24 }
 0x637   : > { %v2342_v0 = vmul.f32 %v3439_v17, %v4401_v30  ;;  %v3441_v53 = vpop.eup %3440  ;;  %3460 = vtanh.f32 %v4687_v39 }
 0x638   : > { %2355 = vrot.lane.b32.xlu0 %v2333_v5, %s3778_s8  ;;  %v3443_v29 = vpop.eup %3442  ;;  %v1662_v63 = vmul.f32 %v3441_v53, %v4703_v22  ;;  %3462 = vtanh.f32 %v4691_v6 }
 0x639   : > { %v3445_v47 = vpop.eup %3444  ;;  %v1663_v61 = vmul.f32 %v3443_v29, %v4708_v51  ;;  %v3474_v29 = vld [vmem:[%s4098_s14] sm:$0xff]  ;;  %3464 = vtanh.f32 %v4695_v40  ;;  %v3477_v40 = vld [vmem:[%s4098_s14 + $0x38] sm:$0xff] }
 0x63a   : > { %2357 = vrot.lane.b32.xlu1 %v2334_v46, %s3778_s8  ;;  %v1660_v17 = vmul.f32 %v3445_v47, %v4716_v50  ;;  %3466 = vtanh.f32 %v4699_v28 }
 0x63b   : > { %3468 = vtanh.f32 %v4693_v38 }
 0x63c   : > { %2351 = vrot.lane.b32.xlu0 %v2331_v44, %s3778_s8  ;;  %v1676_v50 = vadd.f32 %v3474_v29, %v1660_v17  ;;  %3470 = vtanh.f32 %v4697_v41 }
 0x63e   : > { %2353 = vrot.lane.b32.xlu1 %v2332_v20, %s3778_s8 }
 0x640   : > { %2363 = vrot.lane.b32.xlu0 %v2337_v11, %s3778_s8 }
 0x642   : > { %2365 = vrot.lane.b32.xlu1 %v2338_v60, %s3778_s8 }
 0x644   : > { %2359 = vrot.lane.b32.xlu0 %v2335_v10, %s3778_s8 }
 0x646   : > { %2361 = vrot.lane.b32.xlu1 %v2336_v42, %s3778_s8 }
 0x648   : > { %2367 = vrot.lane.b32.xlu0 %v2339_v45, %s3778_s8 }
 0x64a   : > { %2369 = vrot.lane.b32.xlu1 %v2340_v13, %s3778_s8  ;;  %v1882_v21 = vpop.permute.xlu0 %1881  ;;  %v3447_v13 = vpop.eup %3446 }
 0x64b   : > { %v1661_v51 = vmul.f32 %v3447_v13, %v4722_v8  ;;  %v3475_v13 = vld [vmem:[%s4098_s14 + $0x8] sm:$0xff] }
 0x64c   : > { %2371 = vrot.lane.b32.xlu0 %v2341_v14, %s3778_s8  ;;  %v1884_v23 = vpop.permute.xlu1 %1883  ;;  %v3472_v14 = vld [vmem:[%s4098_s14 + $0x10] sm:$0xff] }
 0x64d   : > { %v1677_v17 = vadd.f32 %v3475_v13, %v1661_v51  ;;  %v3478_v51 = vld [vmem:[%s4098_s14 + $0x20] sm:$0xff]  ;;  %v3480_v13 = vld [vmem:[%s4098_s14 + $0x50] sm:$0xff] }
 0x64e   : > { %2373 = vrot.lane.b32.xlu1 %v2342_v0, %s3778_s8  ;;  %v2115_v12 = vpop.permute.xlu0 %2114  ;;  %v1678_v0 = vadd.f32 %v3472_v14, %v1662_v63 }
 0x650   : > { %v4877_v48 = vpop.permute.xlu1 %2116  ;;  %v1911_v53 = vadd.f32 %v1882_v21, %v1678_v0 }
 0x652   : > { %v4879_v25 = vpop.permute.xlu0 %1877  ;;  %v2144_v24 = vadd.f32 %v2115_v12, %v1911_v53 }
 0x653   : > { %v1909_v8 = vadd.f32 %v4879_v25, %v1676_v50 }
 0x654   : > { %v4881_v18 = vpop.permute.xlu1 %1879 }
 0x656   : > { %v4883_v35 = vpop.permute.xlu0 %2110 }
 0x658   : > { %v4885_v36 = vpop.permute.xlu1 %2112 }
 0x662   : > { %v4887_v34 = vpop.permute.xlu0 %1889 }
 0x664   : > { %v4889_v7 = vpop.permute.xlu1 %1891 }
 0x666   : > { %v4891_v5 = vpop.permute.xlu0 %2122 }
 0x668   : > { %v4893_v55 = vpop.permute.xlu1 %2124 }
 0x66a   : > { %v4895_v46 = vpop.permute.xlu0 %1885 }
 0x66c   : > { %v4897_v9 = vpop.permute.xlu1 %1887 }
 0x66e   : > { %v4899_v44 = vpop.permute.xlu0 %2118 }
 0x670   : > { %v4901_v27 = vpop.permute.xlu1 %2120 }
 0x672   : > { %v4903_v20 = vpop.permute.xlu0 %1897 }
 0x674   : > { %v4905_v19 = vpop.permute.xlu1 %1899 }
 0x682   : > { %v4907_v11 = vpop.permute.xlu0 %2130 }
 0x684   : > { %v4909_v52 = vpop.permute.xlu1 %2132 }
 0x686   : > { %v4911_v60 = vpop.permute.xlu0 %1893 }
 0x688   : > { %v4913_v1 = vpop.permute.xlu1 %1895 }
 0x68a   : > { %v4916_v10 = vpop.permute.xlu0 %2126 }
 0x68c   : > { %v4919_v15 = vpop.permute.xlu1 %2128 }
 0x68e   : > { %v4923_v42 = vpop.permute.xlu0 %1905 }
 0x690   : > { %v4926_v59 = vpop.permute.xlu1 %1907 }
 0x691   : > { %5117 = vst [vmem:[#allocation20_spill] sm:$0xff] %v4926_v59 }
 0x696   : > { %v4929_v45 = vpop.permute.xlu0 %2138 }
 0x697   : > { %5118 = vst [vmem:[#allocation21_spill] sm:$0xff] %v4929_v45  ;;  %v1679_v45 = vadd.f32 %v3473_v2, %v1663_v61 }
 0x698   : > { %v4932_v26 = vpop.permute.xlu1 %2140 }
 0x699   : > { %5119 = vst [vmem:[#allocation22_spill] sm:$0xff] %v4932_v26  ;;  %v3449_v26 = vpop.eup %3448  ;;  %v1912_v63 = vadd.f32 %v1884_v23, %v1679_v45  ;;  %v3476_v45 = vld [vmem:[%s4098_s14 + $0x30] sm:$0xff] }
 0x69a   : > { %v4936_v4 = vpop.permute.xlu0 %1901  ;;  %v3451_v22 = vpop.eup %3450  ;;  %v1666_v14 = vmul.f32 %v3449_v26, %v4735_v16  ;;  %v1910_v16 = vadd.f32 %v4881_v18, %v1677_v17 }
 0x69b   : > { %v3453_v59 = vpop.eup %3452  ;;  %v1667_v39 = vmul.f32 %v3451_v22, %v4739_v3  ;;  %v2145_v61 = vadd.f32 %v4877_v48, %v1912_v63  ;;  %v2142_v3 = vadd.f32 %v4883_v35, %v1909_v8 }
 0x69c   : > { %v4941_v56 = vpop.permute.xlu1 %1903  ;;  %v3455_v0 = vpop.eup %3454  ;;  %v1664_v6 = vmul.f32 %v3453_v59, %v4748_v62  ;;  %v1682_v26 = vadd.f32 %v3476_v45, %v1666_v14  ;;  %v2143_v35 = vadd.f32 %v4885_v36, %v1910_v16 }
 0x69d   : > { %v3457_v12 = vpop.eup %3456  ;;  %v1683_v62 = vadd.f32 %v3477_v40, %v1667_v39  ;;  %v1665_v25 = vmul.f32 %v3455_v0, %v4754_v37 }
 0x69e   : > { %v4945_v57 = vpop.permute.xlu0 %2134  ;;  %v1915_v59 = vadd.f32 %v4887_v34, %v1682_v26  ;;  %v3459_v53 = vpop.eup %3458  ;;  %v1680_v29 = vadd.f32 %v3478_v51, %v1664_v6  ;;  %v1670_v28 = vmul.f32 %v3457_v12, %v4764_v49  ;;  %v3479_v34 = vld [vmem:[%s4098_s14 + $0x28] sm:$0xff] }
 0x69f   : > { %v3461_v63 = vpop.eup %3460  ;;  %v1916_v37 = vadd.f32 %v4889_v7, %v1683_v62  ;;  %v1671_v0 = vmul.f32 %v3459_v53, %v4770_v54 }
 0x6a0   : > { %v4951_v47 = vpop.permute.xlu1 %2136  ;;  %v2148_v38 = vadd.f32 %v4891_v5, %v1915_v59  ;;  %v3463_v39 = vpop.eup %3462  ;;  %v1913_v49 = vadd.f32 %v4895_v46, %v1680_v29  ;;  %v1668_v7 = vmul.f32 %v3461_v63, %v4792_v32  ;;  %v1686_v17 = vadd.f32 %v3480_v13, %v1670_v28  ;;  %v3484_v29 = vld [vmem:[%s4098_s14 + $0x60] sm:$0xff] }
 0x6a1   : > { %v1669_v46 = vmul.f32 %v3463_v39, %v4371_v58 }
 0x6a2   : > { %v2348_v21 = vpop.permute.xlu0 %2347  ;;  %v2146_v8 = vadd.f32 %v4899_v44, %v1913_v49  ;;  %v1919_v32 = vadd.f32 %v4903_v20, %v1686_v17  ;;  %v3482_v44 = vld [vmem:[%s4098_s14 + $0x40] sm:$0xff]  ;;  %v3483_v20 = vld [vmem:[%s4098_s14 + $0x48] sm:$0xff] }
 0x6a3   : > { %v2377_v2 = vadd.f32 %v2348_v21, %v2144_v24  ;;  %v1681_v24 = vadd.f32 %v3479_v34, %v1665_v25  ;;  %v2149_v21 = vadd.f32 %v4893_v55, %v1916_v37  ;;  %v1685_v62 = vadd.f32 %v3483_v20, %v1669_v46 }
 0x6a4   : > { %v2350_v23 = vpop.permute.xlu1 %2349  ;;  %v2152_v58 = vadd.f32 %v4907_v11, %v1919_v32 }
 0x6a5   : > { %2393 = vst [vmem:[%s4966_s23 + $0x10] sm:$0xff] %v2377_v2  ;;  %v2378_v48 = vadd.f32 %v2350_v23, %v2145_v61  ;;  %v1914_v61 = vadd.f32 %v4897_v9, %v1681_v24  ;;  %v3465_v2 = vpop.eup %3464  ;;  %v3481_v23 = vld [vmem:[%s4098_s14 + $0x58] sm:$0xff]  ;;  %v1918_v53 = vadd.f32 %v4913_v1, %v1685_v62 }
 0x6a6   : > { %v2344_v18 = vpop.permute.xlu0 %2343  ;;  %v1687_v12 = vadd.f32 %v3481_v23, %v1671_v0  ;;  %v3467_v16 = vpop.eup %3466  ;;  %v1672_v40 = vmul.f32 %v3465_v2, %v4396_v33 }
 0x6a7   : > { %2394 = vst [vmem:[%s4966_s23 + $0x18] sm:$0xff] %v2378_v48  ;;  %v2375_v22 = vadd.f32 %v2344_v18, %v2142_v3  ;;  %v2147_v6 = vadd.f32 %v4901_v27, %v1914_v61  ;;  %v1684_v3 = vadd.f32 %v3482_v44, %v1668_v7  ;;  %v3469_v26 = vpop.eup %3468  ;;  %v5121_v7 = vld [vmem:[#allocation21_spill] sm:$0xff]  ;;  %v5122_v61 = vld [vmem:[#allocation22_spill] sm:$0xff] }
 0x6a8   : > { %v2346_v50 = vpop.permute.xlu1 %2345  ;;  %v1920_v48 = vadd.f32 %v4905_v19, %v1687_v12  ;;  %v3471_v18 = vpop.eup %3470  ;;  %v1674_v33 = vmul.f32 %v3469_v26, %v4404_v43  ;;  %v1688_v28 = vadd.f32 %v3484_v29, %v1672_v40  ;;  %v3485_v43 = vld [vmem:[%s4098_s14 + $0x68] sm:$0xff] }
 0x6a9   : > { %2391 = vst [vmem:[%s4966_s23] sm:$0xff] %v2375_v22  ;;  %v2376_v36 = vadd.f32 %v2346_v50, %v2143_v35  ;;  %v1917_v59 = vadd.f32 %v4911_v60, %v1684_v3  ;;  %v1673_v22 = vmul.f32 %v3467_v16, %v4392_v31  ;;  %v1675_v60 = vmul.f32 %v3471_v18, %v4401_v30 }
 0x6aa   : > { %v2356_v14 = vpop.permute.xlu0 %2355  ;;  %v2153_v35 = vadd.f32 %v4909_v52, %v1920_v48  ;;  %v2151_v31 = vadd.f32 %v4919_v15, %v1918_v53  ;;  %v1921_v63 = vadd.f32 %v4936_v4, %v1688_v28 }
 0x6ab   : > { %2392 = vst [vmem:[%s4966_s23 + $0x8] sm:$0xff] %v2376_v36  ;;  %v2381_v41 = vadd.f32 %v2356_v14, %v2148_v38  ;;  %v2150_v51 = vadd.f32 %v4916_v10, %v1917_v59  ;;  %v1689_v37 = vadd.f32 %v3485_v43, %v1673_v22  ;;  %v3486_v10 = vld [vmem:[%s4098_s14 + $0x70] sm:$0xff]  ;;  %v3487_v14 = vld [vmem:[%s4098_s14 + $0x78] sm:$0xff]  ;;  %s3692_s14 = scalar_lea.vmem %s3691_s13, 4096 }
 0x6ac   : > { %v2358_v5 = vpop.permute.xlu1 %2357  ;;  %v1690_v36 = vadd.f32 %v3486_v10, %v1674_v33  ;;  %v2154_v30 = vadd.f32 %v4945_v57, %v1921_v63  ;;  %v1691_v39 = vadd.f32 %v3487_v14, %v1675_v60  ;;  %p3694_p12 = scmp.lt.s32.totalorder %s3692_s14, %s3686_s10 }
 0x6ad   : > { %2397 = vst [vmem:[%s4966_s23 + $0x30] sm:$0xff] %v2381_v41  ;;  %v2382_v55 = vadd.f32 %v2358_v5, %v2149_v21  ;;  %v1922_v34 = vadd.f32 %v4941_v56, %v1689_v37  ;;  %v5120_v41 = vld [vmem:[#allocation20_spill] sm:$0xff] }
 0x6ae   : > { %v2352_v54 = vpop.permute.xlu0 %2351  ;;  %v1923_v4 = vadd.f32 %v4923_v42, %v1690_v36  ;;  %v1924_v56 = vadd.f32 %v5120_v41, %v1691_v39  ;;  %p3695_p13 = por %p3694_p12, %p3693_p11 }
 0x6af   : > { %2398 = vst [vmem:[%s4966_s23 + $0x38] sm:$0xff] %v2382_v55  ;;  %v2379_v9 = vadd.f32 %v2352_v54, %v2146_v8  ;;  %v2155_v21 = vadd.f32 %v4951_v47, %v1922_v34 }
 0x6b0   : > { %v2354_v45 = vpop.permute.xlu1 %2353  ;;  %v2156_v57 = vadd.f32 %v5121_v7, %v1923_v4  ;;  %v2157_v8 = vadd.f32 %v5122_v61, %v1924_v56  ;;  %p3696_p7 = pnand %p3695_p13, %p3689_p1 }
 0x6b1   : > { %2395 = vst [vmem:[%s4966_s23 + $0x20] sm:$0xff] %v2379_v9  ;;  %v2380_v27 = vadd.f32 %v2354_v45, %v2147_v6 }
 0x6b2   : > { %v2364_v25 = vpop.permute.xlu0 %2363 }
 0x6b3   : > { %2396 = vst [vmem:[%s4966_s23 + $0x28] sm:$0xff] %v2380_v27  ;;  %v2385_v19 = vadd.f32 %v2364_v25, %v2152_v58 }
 0x6b4   : > { %v2366_v11 = vpop.permute.xlu1 %2365 }
 0x6b5   : > { %2401 = vst [vmem:[%s4966_s23 + $0x50] sm:$0xff] %v2385_v19  ;;  %v2386_v52 = vadd.f32 %v2366_v11, %v2153_v35 }
 0x6b6   : > { %v2360_v50 = vpop.permute.xlu0 %2359 }
 0x6b7   : > { %2402 = vst [vmem:[%s4966_s23 + $0x58] sm:$0xff] %v2386_v52  ;;  %v2383_v1 = vadd.f32 %v2360_v50, %v2150_v51 }
 0x6b8   : > { %v2362_v38 = vpop.permute.xlu1 %2361 }
 0x6b9   : > { %2399 = vst [vmem:[%s4966_s23 + $0x40] sm:$0xff] %v2383_v1  ;;  %v2384_v24 = vadd.f32 %v2362_v38, %v2151_v31 }
 0x6ba   : > { %v2368_v15 = vpop.permute.xlu0 %2367 }
 0x6bb   : > { %2400 = vst [vmem:[%s4966_s23 + $0x48] sm:$0xff] %v2384_v24  ;;  %v2387_v49 = vadd.f32 %v2368_v15, %v2154_v30 }
 0x6bc   : > { %v2370_v0 = vpop.permute.xlu1 %2369 }
 0x6bd   : > { %2403 = vst [vmem:[%s4966_s23 + $0x60] sm:$0xff] %v2387_v49  ;;  %v2388_v5 = vadd.f32 %v2370_v0, %v2155_v21 }
 0x6be   : > { %v2372_v42 = vpop.permute.xlu0 %2371 }
 0x6bf   : > { %2404 = vst [vmem:[%s4966_s23 + $0x68] sm:$0xff] %v2388_v5  ;;  %v2389_v47 = vadd.f32 %v2372_v42, %v2156_v57 }
 0x6c0   : > { %v2374_v13 = vpop.permute.xlu1 %2373 }
 0x6c1   : > { %2405 = vst [vmem:[%s4966_s23 + $0x70] sm:$0xff] %v2389_v47  ;;  %v2390_v17 = vadd.f32 %v2374_v13, %v2157_v8 }
 0x6c3   : > { %2406 = vst [vmem:[%s4966_s23 + $0x78] sm:$0xff] %v2390_v17 }
 0x6c4   : > { %3699 = shalt.err (!%p3696_p7)
}
 0x6c5   : > { %s3700_s8 = scalar_lea.hbm %s5035_s18, 2048  ;;  %s3704_s23 = scalar_lea.hbm %s5089_s7, 8192 }
 0x6c6   : > { %p3701_p6 = scmp.ne.s32.totalorder %s5035_s18, %s3700_s8  ;;  %p3705_p3 = scmp.lt.u32.totalorder %s5035_s18, %s5089_s7 }
 0x6c7   : > { %p3706_p0 = scmp.lt.u32.totalorder %s3704_s23, %s3700_s8  ;;  %p3708_p5 = scmp.lt.u32.totalorder %s3700_s8, %s5035_s18 }
 0x6c8   : > { %p3702_p8 = pnand %p3701_p6, %p5123_p4 }
 0x6c9   : > { %p3707_p2 = por %p3706_p0, %p3705_p3 }
 0x6ca   : > { %p3703_p9 = pneg %p3702_p8 }
 0x6cb   : > { %p3709_p10 = por %p3708_p5, %p3707_p2 }
 0x6cd   : > { %p3710_p1 = pnand %p3709_p10, %p3703_p9 }
 0x6cf   : > { %3713 = shalt.err (!%p3710_p1)
}
 0x6d0   : > { %s3782_s12 = smov 128   ;;  %s3783_s10 = smov 8  }
 0x6d1   : > { %3173 = dma.vmem_to_hbm [thread:$0]  (%p5123_p4), %s5037_s9, 2048, %s5035_s18, %s2408_s30, %s3782_s12, %s3782_s12, %s3783_s10  }
 0x6d2 PF: > { %p3215_p11 = scmp.ge.s32.totalorder %s3764_s27, 2  ;;  %s2436_s22 = sand.u32 1, %s3752_s24  }
 0x6d3   : > { %p5124_p12 = scmp.ne.s32.totalorder %s5107_s21, 0  ;;  %s2437_s13 = scalar_lea.sflag [#allocation4], %s2436_s22 }
 0x6d5   : > { %p3199_p13 = pnand %p3215_p11, %p5124_p12 }
 0x6d7   : > { %3747 = dma.done.wait (!%p3199_p13), %s2437_s13, 2048  }
 0x6d8   : > { %3749 = vsyncadd (!%p3199_p13), %s2437_s13, 4294965248  ;;  %p23_p7 = scmp.ge.s32.totalorder %s4010_s19, 6   ;;  %s5125_s24 = smov %s3756_s25 }
 0x6d9   : > { %s5126_s25 = smov %s3760_s26  ;;  %s5127_s26 = smov %s4021_s17 }
 0x6da   : > { %s5128_s27 = smov %s4010_s19  ;;  %25 = sbr.rel (!%p23_p7) target bundleno = 8 (0x8), region = 117 }
 0x6e1   :  { %2442 = vsyncpa [#allocation3], 1 }
 0x6e2   :  { %2444 = vsyncpa [#allocation3 + $0x1], 1 }
 0x6e3   :  { %2445 = vsyncpa [#allocation6], 1 }
 0x6e4   :  { %2446 = vsyncpa [#allocation9], 1 }
 0x6e5   :  { %2447 = vsyncpa [#allocation12], 1 }
 0x6e6   :  { %2448 = vsyncpa [#allocation4], 1 }
 0x6e7   :  { %2450 = vsyncpa [#allocation4 + $0x1], 1 }

</bundles_post_ra>
